<compile_context>
chip_gen: v6e
topology: v6e:2x2x1
jax: 0.10.0
libtpu: 0.0.40
codegen_flags: <defaults>
</compile_context>

<pallas_src>
import functools

import jax
import jax.numpy as jnp
import numpy as np
from jax.experimental import pallas as pl

# ---- hyperparameters (module __init__ args) ----
N_HEAD = 4
D_MODEL = 32
D_K = 8
D_V = 8
BOTTLE_NECK = 16          # input_dim of the attention block
DIAG_MASK = True          # diag_mask == 'True'
EPS = 1e-5                # torch.nn.LayerNorm default eps
MASK_FILL = -1e32


def _norm(x):
    """LayerNorm without affine (the affine is folded into the following matmul)."""
    mu = jnp.mean(x, axis=-1, keepdims=True)
    var = jnp.mean((x - mu) ** 2, axis=-1, keepdims=True)
    return (x - mu) * jax.lax.rsqrt(var + EPS)


def encoder_layer_kernel(dyn_ref, stat_ref, npm_ref,
                         wqk_ref, wv_ref, fc1_ref, fc2_ref,
                         c1w_ref, c2w_ref, pack_ref,
                         dyn_out, stat_out, attn_out, *, B, L):
    H, DK, DV, DM = N_HEAD, D_K, D_V, D_MODEL

    x_qk = dyn_ref[...]                      # (B*L, bottle_neck)  q == k == dynamic
    x_v = stat_ref[...]                      # (B*L, bottle_neck)  v == static
    npm = npm_ref[...]                       # (B*L, 1)            non_pad_mask
    P = pack_ref[...]                        # (5, 2*H*DK)         packed biases + alpha

    bqk = P[0:1, :]                          # (1, 2*H*DK)  folded LN1/LN2 biases (qk)
    bv = P[1:2, :H * DV]                     # (1, H*DV)    folded LN3 bias (v)
    c1b = P[2:3, :DM]                        # (1, DM)      folded pff-LN bias + conv0 bias
    c2b = P[3:4, :DM]                        # (1, DM)      conv1 bias
    alpha = P[4, 0]                          # scalar       pff residual alpha

    # --- MultiHeadAttention: one normalization pass for q/k, one for v ---
    n_qk = _norm(x_qk)
    n_v = _norm(x_v)

    # fused q|k projection (LN affine + 1/sqrt(d_k) already folded into the weights)
    qk = jnp.dot(n_qk, wqk_ref[...], preferred_element_type=jnp.float32) + bqk   # (B*L, 2*H*DK)
    vp = jnp.dot(n_v, wv_ref[...], preferred_element_type=jnp.float32) + bv      # (B*L, H*DV)

    # split heads: (B*L, H*d) -> (H*B, L, d), matching torch's permute(2,0,1,3)
    qh = qk[:, :H * DK].reshape(B * L, H, DK).transpose(1, 0, 2).reshape(H * B, L, DK)
    kh = qk[:, H * DK:].reshape(B * L, H, DK).transpose(1, 0, 2).reshape(H * B, L, DK)
    vh = vp.reshape(B * L, H, DV).transpose(1, 0, 2).reshape(H * B, L, DV)

    # batched scores for all heads*batches at once (temperature folded into Wq)
    scores = jnp.einsum('nld,nmd->nlm', qh, kh,
                        preferred_element_type=jnp.float32)                      # (H*B, L, L)
    if DIAG_MASK:
        row = jax.lax.broadcasted_iota(jnp.int32, (L, L), 0)
        col = jax.lax.broadcasted_iota(jnp.int32, (L, L), 1)
        scores = scores + jnp.where(row == col, MASK_FILL, 0.0)[None]            # single add
    attn = jax.nn.softmax(scores, axis=-1)                                        # (H*B, L, L)

    # lane-dense attention store: one (H*B, L*L) slab (wrapper reshapes back)
    attn_out[...] = attn.reshape(H * B, L * L)

    ctx = jnp.einsum('nlm,nmd->nld', attn, vh,
                     preferred_element_type=jnp.float32)                          # (H*B, L, DV)
    # (H*B, L, DV) -> (B*L, H*DV), head-major columns (torch permute(1,2,0,3))
    dyn_cat = ctx.reshape(H, B, L, DV).transpose(1, 2, 0, 3).reshape(B * L, H * DV)

    dyn_p = jnp.dot(dyn_cat, fc1_ref[...], preferred_element_type=jnp.float32)    # (B*L, d_model)
    stat_out[...] = jnp.dot(vp, fc2_ref[...], preferred_element_type=jnp.float32)  # no npm (matches module)

    # --- pff_n1: PositionwiseFeedForward([d_model]*3, residual, layer_norm) ---
    x = dyn_p * npm
    h1 = jnp.dot(_norm(x), c1w_ref[...], preferred_element_type=jnp.float32) + c1b
    h1 = h1 * jax.nn.sigmoid(h1)                                                   # swish
    h2 = jnp.dot(h1, c2w_ref[...], preferred_element_type=jnp.float32) + c2b
    dyn_out[...] = (alpha * h2 + x) * npm


def encoder_layer(dyn, stat, npm, params):
    (ln1_g, ln1_b, ln2_g, ln2_b, ln3_g, ln3_b,
     wq, wk, wv, fc1, fc2,
     pln_g, pln_b, c1_w, c1_b, c2_w, c2_b, alpha) = params
    B, L, c_in = dyn.shape
    scale = 1.0 / float(np.sqrt(D_K))

    # Fold LayerNorm affines (and the softmax temperature) into the projection weights:
    #   LN(x) @ W = norm(x) @ (g[:,None]*W) + b @ W
    wq_f = (ln1_g.reshape(-1, 1) * wq) * scale
    bq_f = (ln1_b @ wq) * scale
    wk_f = ln2_g.reshape(-1, 1) * wk
    bk_f = ln2_b @ wk
    wv_f = ln3_g.reshape(-1, 1) * wv
    bv_f = ln3_b @ wv
    wqk = jnp.concatenate([wq_f, wk_f], axis=1)            # (c_in, 2*H*Dk)  fused q|k projection
    bqk = jnp.concatenate([bq_f, bk_f], axis=1)            # (1, 2*H*Dk)

    # Fold the pff LayerNorm affine into the first 1x1 conv
    c1w_f = pln_g.reshape(-1, 1) * c1_w
    c1b_f = pln_b @ c1_w + c1_b

    # Pack all remaining small vectors + alpha into ONE small VMEM buffer
    W = 2 * N_HEAD * D_K

    def _row(v):
        v = v.reshape(1, -1)
        return jnp.pad(v, ((0, 0), (0, W - v.shape[1])))

    pack = jnp.concatenate(
        [_row(bqk), _row(bv_f), _row(c1b_f), _row(c2_b), _row(alpha)], axis=0)   # (5, 2*H*Dk)

    kernel = functools.partial(encoder_layer_kernel, B=B, L=L)

    # Single grid step, whole-array VMEM blocks (problem is a few KB total).
    dyn_o, stat_o, attn = pl.pallas_call(
        kernel,
        out_shape=(
            jax.ShapeDtypeStruct((B * L, D_MODEL), jnp.float32),
            jax.ShapeDtypeStruct((B * L, D_MODEL), jnp.float32),
            jax.ShapeDtypeStruct((N_HEAD * B, L * L), jnp.float32),   # lane-dense attn slab
        ),
    )(dyn.reshape(B * L, c_in), stat.reshape(B * L, c_in), npm.reshape(B * L, 1),
      wqk, wv_f, fc1, fc2, c1w_f, c2_w, pack)

    # wrapper-side layout plumbing back to the torch shapes
    return (dyn_o.reshape(B, L, D_MODEL),
            stat_o.reshape(B, L, D_MODEL),
            attn.reshape(N_HEAD * B, L, L))


# ---------- pure-JAX reference (mirrors the PyTorch forward, unfolded params) ----------
def reference(dyn, stat, npm, params):
    (ln1_g, ln1_b, ln2_g, ln2_b, ln3_g, ln3_b,
     wq, wk, wv, fc1, fc2,
     pln_g, pln_b, c1_w, c1_b, c2_w, c2_b, alpha) = params
    B, L, _ = dyn.shape

    def ln(x, g, b):
        mu = x.mean(-1, keepdims=True)
        var = ((x - mu) ** 2).mean(-1, keepdims=True)
        return (x - mu) / jnp.sqrt(var + EPS) * g + b

    q = ln(dyn, ln1_g, ln1_b) @ wq
    k = ln(dyn, ln2_g, ln2_b) @ wk
    v = ln(stat, ln3_g, ln3_b) @ wv
    qh = q.reshape(B, L, N_HEAD, D_K).transpose(2, 0, 1, 3)
    kh = k.reshape(B, L, N_HEAD, D_K).transpose(2, 0, 1, 3)
    vh = v.reshape(B, L, N_HEAD, D_V).transpose(2, 0, 1, 3)
    scores = jnp.einsum('hbqd,hbkd->hbqk', qh, kh) / (D_K ** 0.5)
    if DIAG_MASK:
        eye = jnp.eye(L, dtype=bool)
        scores = jnp.where(eye[None, None], MASK_FILL, scores)
    attn = jax.nn.softmax(scores, axis=-1)
    out = jnp.einsum('hbqk,hbkd->hbqd', attn, vh)
    dyn_cat = out.transpose(1, 2, 0, 3).reshape(B, L, N_HEAD * D_V)
    stat_cat = vh.transpose(1, 2, 0, 3).reshape(B, L, N_HEAD * D_V)
    dyn_p = dyn_cat @ fc1
    stat_p = stat_cat @ fc2
    x = dyn_p * npm
    h = ln(x, pln_g, pln_b) @ c1_w + c1_b
    h = h * jax.nn.sigmoid(h)
    h = h @ c2_w + c2_b
    outd = (alpha[0, 0] * h + x) * npm
    return outd, stat_p, attn.reshape(N_HEAD * B, L, L)


if __name__ == "__main__":
    key = jax.random.PRNGKey(0)
    keys = jax.random.split(key, 24)
    B, L = 2, 8

    def nrm(k, shape, std=0.1):
        return (jax.random.normal(k, shape) * std).astype(jnp.float32)

    dynamic = nrm(keys[0], (B, L, BOTTLE_NECK), 1.0)
    static = nrm(keys[1], (B, L, BOTTLE_NECK), 1.0)
    non_pad_mask = (jax.random.uniform(keys[2], (B, L, 1)) > 0.2).astype(jnp.float32)
    # TODO(synk): dropout_mul / dropout_pff are identity at inference and omitted;
    # pff_n2 is never used in EncoderLayer.forward and is not implemented;
    # slf_attn_mask is ignored by the module on this path (it builds its own diag mask).

    std_qk = (2.0 / (D_MODEL + D_K)) ** 0.5
    std_v = (2.0 / (D_MODEL + D_V)) ** 0.5
    params = (
        nrm(keys[3], (1, BOTTLE_NECK)) + 1.0, nrm(keys[4], (1, BOTTLE_NECK)),    # layer_norm1
        nrm(keys[5], (1, BOTTLE_NECK)) + 1.0, nrm(keys[6], (1, BOTTLE_NECK)),    # layer_norm2
        nrm(keys[7], (1, BOTTLE_NECK)) + 1.0, nrm(keys[8], (1, BOTTLE_NECK)),    # layer_norm3
        nrm(keys[9], (BOTTLE_NECK, N_HEAD * D_K), std_qk),                       # w_qs (in,out)
        nrm(keys[10], (BOTTLE_NECK, N_HEAD * D_K), std_qk),                      # w_ks (in,out)
        nrm(keys[11], (BOTTLE_NECK, N_HEAD * D_V), std_v),                       # w_vs (in,out)
        nrm(keys[12], (N_HEAD * D_V, D_MODEL)),                                  # fc1 (no bias)
        nrm(keys[13], (N_HEAD * D_V, D_MODEL)),                                  # fc2 (no bias)
        nrm(keys[14], (1, D_MODEL)) + 1.0, nrm(keys[15], (1, D_MODEL)),          # pff layer_norm
        nrm(keys[16], (D_MODEL, D_MODEL)), nrm(keys[17], (1, D_MODEL)),          # pff conv0 (w,b)
        nrm(keys[18], (D_MODEL, D_MODEL)), nrm(keys[19], (1, D_MODEL)),          # pff conv1 (w,b)
        jnp.full((1, 1), 0.5, jnp.float32),                                      # pff alpha
    )

    dyn_o, stat_o, attn = encoder_layer(dynamic, static, non_pad_mask, params)
    jax.block_until_ready((dyn_o, stat_o, attn))

    rd, rs, ra = reference(dynamic, static, non_pad_mask, params)
    np.testing.assert_allclose(np.asarray(dyn_o), np.asarray(rd), rtol=1e-4, atol=1e-4)
    np.testing.assert_allclose(np.asarray(stat_o), np.asarray(rs), rtol=1e-4, atol=1e-4)
    np.testing.assert_allclose(np.asarray(attn), np.asarray(ra), rtol=1e-4, atol=1e-4)
    print("KERNEL_OK")
</pallas_src>

<mosaic_0001>
module attributes {stable_mosaic.version = 11 : i64} {
  func.func @encoder_layer_kernel(%arg0: memref<16x16xf32, #tpu.memory_space<vmem>>, %arg1: memref<16x16xf32, #tpu.memory_space<vmem>>, %arg2: memref<16x1xf32, #tpu.memory_space<vmem>>, %arg3: memref<16x64xf32, #tpu.memory_space<vmem>>, %arg4: memref<16x32xf32, #tpu.memory_space<vmem>>, %arg5: memref<32x32xf32, #tpu.memory_space<vmem>>, %arg6: memref<32x32xf32, #tpu.memory_space<vmem>>, %arg7: memref<32x32xf32, #tpu.memory_space<vmem>>, %arg8: memref<32x32xf32, #tpu.memory_space<vmem>>, %arg9: memref<5x64xf32, #tpu.memory_space<vmem>>, %arg10: memref<16x32xf32, #tpu.memory_space<vmem>>, %arg11: memref<16x32xf32, #tpu.memory_space<vmem>>, %arg12: memref<8x64xf32, #tpu.memory_space<vmem>>) attributes {dimension_semantics = [], scalar_prefetch = 0 : i64, scratch_operands = 0 : i64, tpu.core_type = #tpu.core_type<tc>} {
    %c0 = arith.constant 0 : index
    %c0_0 = arith.constant 0 : index
    %0 = vector.load %arg0[%c0, %c0_0] : memref<16x16xf32, #tpu.memory_space<vmem>>, vector<16x16xf32>
    %c0_1 = arith.constant 0 : index
    %c0_2 = arith.constant 0 : index
    %1 = vector.load %arg1[%c0_1, %c0_2] : memref<16x16xf32, #tpu.memory_space<vmem>>, vector<16x16xf32>
    %c0_3 = arith.constant 0 : index
    %c0_4 = arith.constant 0 : index
    %2 = vector.load %arg2[%c0_3, %c0_4] : memref<16x1xf32, #tpu.memory_space<vmem>>, vector<16x1xf32>
    %c0_5 = arith.constant 0 : index
    %c0_6 = arith.constant 0 : index
    %3 = vector.load %arg9[%c0_5, %c0_6] : memref<5x64xf32, #tpu.memory_space<vmem>>, vector<5x64xf32>
    %4 = vector.extract_strided_slice %3 {offsets = [0, 0], sizes = [1, 64], strides = [1, 1]} : vector<5x64xf32> to vector<1x64xf32>
    %5 = vector.extract_strided_slice %3 {offsets = [1, 0], sizes = [1, 32], strides = [1, 1]} : vector<5x64xf32> to vector<1x32xf32>
    %6 = vector.extract_strided_slice %3 {offsets = [2, 0], sizes = [1, 32], strides = [1, 1]} : vector<5x64xf32> to vector<1x32xf32>
    %7 = vector.extract_strided_slice %3 {offsets = [3, 0], sizes = [1, 32], strides = [1, 1]} : vector<5x64xf32> to vector<1x32xf32>
    %8 = vector.extract_strided_slice %3 {offsets = [4, 0], sizes = [1, 1], strides = [1, 1]} : vector<5x64xf32> to vector<1x1xf32>
    %9 = vector.extract %8[0, 0] : f32 from vector<1x1xf32>
    %cst = arith.constant dense<0.000000e+00> : vector<16xf32>
    %10 = vector.multi_reduction <add>, %0, %cst [1] : vector<16x16xf32> to vector<16xf32>
    %11 = vector.shape_cast %10 : vector<16xf32> to vector<16x1xf32>
    %cst_7 = arith.constant 1.600000e+01 : f32
    %12 = vector.broadcast %cst_7 : f32 to vector<16x1xf32>
    %13 = arith.divf %11, %12 : vector<16x1xf32>
    %14 = vector.broadcast %13 : vector<16x1xf32> to vector<16x16xf32>
    %15 = arith.subf %0, %14 : vector<16x16xf32>
    %16 = arith.mulf %15, %15 : vector<16x16xf32>
    %cst_8 = arith.constant dense<0.000000e+00> : vector<16xf32>
    %17 = vector.multi_reduction <add>, %16, %cst_8 [1] : vector<16x16xf32> to vector<16xf32>
    %18 = vector.shape_cast %17 : vector<16xf32> to vector<16x1xf32>
    %cst_9 = arith.constant 1.600000e+01 : f32
    %19 = vector.broadcast %cst_9 : f32 to vector<16x1xf32>
    %20 = arith.divf %18, %19 : vector<16x1xf32>
    %21 = vector.broadcast %13 : vector<16x1xf32> to vector<16x16xf32>
    %22 = arith.subf %0, %21 : vector<16x16xf32>
    %cst_10 = arith.constant 9.99999974E-6 : f32
    %23 = vector.broadcast %cst_10 : f32 to vector<16x1xf32>
    %24 = arith.addf %20, %23 : vector<16x1xf32>
    %25 = math.rsqrt %24 : vector<16x1xf32>
    %26 = vector.broadcast %25 : vector<16x1xf32> to vector<16x16xf32>
    %27 = arith.mulf %22, %26 : vector<16x16xf32>
    %cst_11 = arith.constant dense<0.000000e+00> : vector<16xf32>
    %28 = vector.multi_reduction <add>, %1, %cst_11 [1] : vector<16x16xf32> to vector<16xf32>
    %29 = vector.shape_cast %28 : vector<16xf32> to vector<16x1xf32>
    %cst_12 = arith.constant 1.600000e+01 : f32
    %30 = vector.broadcast %cst_12 : f32 to vector<16x1xf32>
    %31 = arith.divf %29, %30 : vector<16x1xf32>
    %32 = vector.broadcast %31 : vector<16x1xf32> to vector<16x16xf32>
    %33 = arith.subf %1, %32 : vector<16x16xf32>
    %34 = arith.mulf %33, %33 : vector<16x16xf32>
    %cst_13 = arith.constant dense<0.000000e+00> : vector<16xf32>
    %35 = vector.multi_reduction <add>, %34, %cst_13 [1] : vector<16x16xf32> to vector<16xf32>
    %36 = vector.shape_cast %35 : vector<16xf32> to vector<16x1xf32>
    %cst_14 = arith.constant 1.600000e+01 : f32
    %37 = vector.broadcast %cst_14 : f32 to vector<16x1xf32>
    %38 = arith.divf %36, %37 : vector<16x1xf32>
    %39 = vector.broadcast %31 : vector<16x1xf32> to vector<16x16xf32>
    %40 = arith.subf %1, %39 : vector<16x16xf32>
    %cst_15 = arith.constant 9.99999974E-6 : f32
    %41 = vector.broadcast %cst_15 : f32 to vector<16x1xf32>
    %42 = arith.addf %38, %41 : vector<16x1xf32>
    %43 = math.rsqrt %42 : vector<16x1xf32>
    %44 = vector.broadcast %43 : vector<16x1xf32> to vector<16x16xf32>
    %45 = arith.mulf %40, %44 : vector<16x16xf32>
    %c0_16 = arith.constant 0 : index
    %c0_17 = arith.constant 0 : index
    %46 = vector.load %arg3[%c0_16, %c0_17] : memref<16x64xf32, #tpu.memory_space<vmem>>, vector<16x64xf32>
    %cst_18 = arith.constant dense<0.000000e+00> : vector<16x64xf32>
    %47 = tpu.matmul %27, %46, %cst_18 {dimension_numbers = #tpu.dot_dimension_numbers<[1], [0], [0], [1], [0, 0, 1, 1], [], []>} : vector<16x16xf32>, vector<16x64xf32>, vector<16x64xf32> -> vector<16x64xf32>
    %48 = vector.broadcast %4 : vector<1x64xf32> to vector<16x64xf32>
    %49 = arith.addf %47, %48 : vector<16x64xf32>
    %c0_19 = arith.constant 0 : index
    %c0_20 = arith.constant 0 : index
    %50 = vector.load %arg4[%c0_19, %c0_20] : memref<16x32xf32, #tpu.memory_space<vmem>>, vector<16x32xf32>
    %cst_21 = arith.constant dense<0.000000e+00> : vector<16x32xf32>
    %51 = tpu.matmul %45, %50, %cst_21 {dimension_numbers = #tpu.dot_dimension_numbers<[1], [0], [0], [1], [0, 0, 1, 1], [], []>} : vector<16x16xf32>, vector<16x32xf32>, vector<16x32xf32> -> vector<16x32xf32>
    %52 = vector.broadcast %5 : vector<1x32xf32> to vector<16x32xf32>
    %53 = arith.addf %51, %52 : vector<16x32xf32>
    %54 = vector.extract_strided_slice %49 {offsets = [0, 0], sizes = [16, 32], strides = [1, 1]} : vector<16x64xf32> to vector<16x32xf32>
    %55 = vector.shape_cast %54 : vector<16x32xf32> to vector<16x4x8xf32>
    %56 = tpu.transpose %55, [1, 0, 2] : vector<16x4x8xf32> -> vector<4x16x8xf32>
    %57 = vector.shape_cast %56 : vector<4x16x8xf32> to vector<8x8x8xf32>
    %58 = vector.extract_strided_slice %49 {offsets = [0, 32], sizes = [16, 32], strides = [1, 1]} : vector<16x64xf32> to vector<16x32xf32>
    %59 = vector.shape_cast %58 : vector<16x32xf32> to vector<16x4x8xf32>
    %60 = tpu.transpose %59, [1, 0, 2] : vector<16x4x8xf32> -> vector<4x16x8xf32>
    %61 = vector.shape_cast %60 : vector<4x16x8xf32> to vector<8x8x8xf32>
    %62 = vector.shape_cast %53 : vector<16x32xf32> to vector<16x4x8xf32>
    %63 = tpu.transpose %62, [1, 0, 2] : vector<16x4x8xf32> -> vector<4x16x8xf32>
    %64 = vector.shape_cast %63 : vector<4x16x8xf32> to vector<8x8x8xf32>
    "tpu.trace_start"() <{level = 10 : i32, message = "nld,nmd->nlm"}> : () -> ()
    %cst_22 = arith.constant dense<0.000000e+00> : vector<8x8x8xf32>
    %65 = tpu.matmul %57, %61, %cst_22 {dimension_numbers = #tpu.dot_dimension_numbers<[2], [2], [1], [1], [0, 0, 0, 1, 1, 1], [0], [0]>} : vector<8x8x8xf32>, vector<8x8x8xf32>, vector<8x8x8xf32> -> vector<8x8x8xf32>
    "tpu.trace_stop"() : () -> ()
    %66 = tpu.iota {dimensions = array<i32: 0>} : vector<8x8xi32>
    %67 = tpu.iota {dimensions = array<i32: 1>} : vector<8x8xi32>
    %68 = arith.cmpi eq, %66, %67 : vector<8x8xi32>
    %cst_23 = arith.constant -1.000000e+32 : f32
    %cst_24 = arith.constant 0.000000e+00 : f32
    %69 = vector.broadcast %cst_23 : f32 to vector<8x8xf32>
    %70 = vector.broadcast %cst_24 : f32 to vector<8x8xf32>
    %71 = arith.select %68, %69, %70 : vector<8x8xi1>, vector<8x8xf32>
    %72 = vector.shape_cast %71 : vector<8x8xf32> to vector<1x8x8xf32>
    %73 = vector.broadcast %72 : vector<1x8x8xf32> to vector<8x8x8xf32>
    %74 = arith.addf %65, %73 : vector<8x8x8xf32>
    %cst_25 = arith.constant dense<0xFF800000> : vector<8x8xf32>
    %75 = vector.multi_reduction <maximumf>, %74, %cst_25 [2] : vector<8x8x8xf32> to vector<8x8xf32>
    %cst_26 = arith.constant 0xFF800000 : f32
    %76 = vector.broadcast %cst_26 : f32 to vector<8x8xf32>
    %77 = arith.maximumf %76, %75 : vector<8x8xf32>
    %78 = vector.shape_cast %77 : vector<8x8xf32> to vector<8x8x1xf32>
    %79 = vector.broadcast %78 : vector<8x8x1xf32> to vector<8x8x8xf32>
    %80 = arith.subf %74, %79 : vector<8x8x8xf32>
    %81 = math.exp %80 : vector<8x8x8xf32>
    %cst_27 = arith.constant dense<0.000000e+00> : vector<8x8xf32>
    %82 = vector.multi_reduction <add>, %81, %cst_27 [2] : vector<8x8x8xf32> to vector<8x8xf32>
    %83 = vector.shape_cast %82 : vector<8x8xf32> to vector<8x8x1xf32>
    %84 = vector.broadcast %83 : vector<8x8x1xf32> to vector<8x8x8xf32>
    %85 = arith.divf %81, %84 : vector<8x8x8xf32>
    %86 = vector.shape_cast %85 : vector<8x8x8xf32> to vector<8x64xf32>
    %c0_28 = arith.constant 0 : index
    %c0_29 = arith.constant 0 : index
    %87 = vector.load %arg12[%c0_28, %c0_29] : memref<8x64xf32, #tpu.memory_space<vmem>>, vector<8x64xf32>
    tpu.vector_store %arg12[%c0_28, %c0_29], %86 {strides = array<i32>} : memref<8x64xf32, #tpu.memory_space<vmem>>, vector<8x64xf32>,
    "tpu.trace_start"() <{level = 10 : i32, message = "nlm,nmd->nld"}> : () -> ()
    %cst_30 = arith.constant dense<0.000000e+00> : vector<8x8x8xf32>
    %88 = tpu.matmul %85, %64, %cst_30 {dimension_numbers = #tpu.dot_dimension_numbers<[2], [1], [1], [2], [0, 0, 0, 1, 1, 2], [0], [0]>} : vector<8x8x8xf32>, vector<8x8x8xf32>, vector<8x8x8xf32> -> vector<8x8x8xf32>
    "tpu.trace_stop"() : () -> ()
    %89 = vector.shape_cast %88 : vector<8x8x8xf32> to vector<4x2x8x8xf32>
    %90 = tpu.transpose %89, [1, 2, 0, 3] : vector<4x2x8x8xf32> -> vector<2x8x4x8xf32>
    %91 = vector.shape_cast %90 : vector<2x8x4x8xf32> to vector<16x32xf32>
    %c0_31 = arith.constant 0 : index
    %c0_32 = arith.constant 0 : index
    %92 = vector.load %arg5[%c0_31, %c0_32] : memref<32x32xf32, #tpu.memory_space<vmem>>, vector<32x32xf32>
    %cst_33 = arith.constant dense<0.000000e+00> : vector<16x32xf32>
    %93 = tpu.matmul %91, %92, %cst_33 {dimension_numbers = #tpu.dot_dimension_numbers<[1], [0], [0], [1], [0, 0, 1, 1], [], []>} : vector<16x32xf32>, vector<32x32xf32>, vector<16x32xf32> -> vector<16x32xf32>
    %c0_34 = arith.constant 0 : index
    %c0_35 = arith.constant 0 : index
    %94 = vector.load %arg6[%c0_34, %c0_35] : memref<32x32xf32, #tpu.memory_space<vmem>>, vector<32x32xf32>
    %cst_36 = arith.constant dense<0.000000e+00> : vector<16x32xf32>
    %95 = tpu.matmul %53, %94, %cst_36 {dimension_numbers = #tpu.dot_dimension_numbers<[1], [0], [0], [1], [0, 0, 1, 1], [], []>} : vector<16x32xf32>, vector<32x32xf32>, vector<16x32xf32> -> vector<16x32xf32>
    %c0_37 = arith.constant 0 : index
    %c0_38 = arith.constant 0 : index
    %96 = vector.load %arg11[%c0_37, %c0_38] : memref<16x32xf32, #tpu.memory_space<vmem>>, vector<16x32xf32>
    tpu.vector_store %arg11[%c0_37, %c0_38], %95 {strides = array<i32>} : memref<16x32xf32, #tpu.memory_space<vmem>>, vector<16x32xf32>,
    %97 = vector.broadcast %2 : vector<16x1xf32> to vector<16x32xf32>
    %98 = arith.mulf %93, %97 : vector<16x32xf32>
    %cst_39 = arith.constant dense<0.000000e+00> : vector<16xf32>
    %99 = vector.multi_reduction <add>, %98, %cst_39 [1] : vector<16x32xf32> to vector<16xf32>
    %100 = vector.shape_cast %99 : vector<16xf32> to vector<16x1xf32>
    %cst_40 = arith.constant 3.200000e+01 : f32
    %101 = vector.broadcast %cst_40 : f32 to vector<16x1xf32>
    %102 = arith.divf %100, %101 : vector<16x1xf32>
    %103 = vector.broadcast %102 : vector<16x1xf32> to vector<16x32xf32>
    %104 = arith.subf %98, %103 : vector<16x32xf32>
    %105 = arith.mulf %104, %104 : vector<16x32xf32>
    %cst_41 = arith.constant dense<0.000000e+00> : vector<16xf32>
    %106 = vector.multi_reduction <add>, %105, %cst_41 [1] : vector<16x32xf32> to vector<16xf32>
    %107 = vector.shape_cast %106 : vector<16xf32> to vector<16x1xf32>
    %cst_42 = arith.constant 3.200000e+01 : f32
    %108 = vector.broadcast %cst_42 : f32 to vector<16x1xf32>
    %109 = arith.divf %107, %108 : vector<16x1xf32>
    %110 = vector.broadcast %102 : vector<16x1xf32> to vector<16x32xf32>
    %111 = arith.subf %98, %110 : vector<16x32xf32>
    %cst_43 = arith.constant 9.99999974E-6 : f32
    %112 = vector.broadcast %cst_43 : f32 to vector<16x1xf32>
    %113 = arith.addf %109, %112 : vector<16x1xf32>
    %114 = math.rsqrt %113 : vector<16x1xf32>
    %115 = vector.broadcast %114 : vector<16x1xf32> to vector<16x32xf32>
    %116 = arith.mulf %111, %115 : vector<16x32xf32>
    %c0_44 = arith.constant 0 : index
    %c0_45 = arith.constant 0 : index
    %117 = vector.load %arg7[%c0_44, %c0_45] : memref<32x32xf32, #tpu.memory_space<vmem>>, vector<32x32xf32>
    %cst_46 = arith.constant dense<0.000000e+00> : vector<16x32xf32>
    %118 = tpu.matmul %116, %117, %cst_46 {dimension_numbers = #tpu.dot_dimension_numbers<[1], [0], [0], [1], [0, 0, 1, 1], [], []>} : vector<16x32xf32>, vector<32x32xf32>, vector<16x32xf32> -> vector<16x32xf32>
    %119 = vector.broadcast %6 : vector<1x32xf32> to vector<16x32xf32>
    %120 = arith.addf %118, %119 : vector<16x32xf32>
    %121 = arith.negf %120 : vector<16x32xf32>
    %122 = math.exp %121 : vector<16x32xf32>
    %cst_47 = arith.constant 1.000000e+00 : f32
    %123 = vector.broadcast %cst_47 : f32 to vector<16x32xf32>
    %124 = arith.addf %123, %122 : vector<16x32xf32>
    %125 = arith.divf %123, %124 : vector<16x32xf32>
    %126 = arith.mulf %120, %125 : vector<16x32xf32>
    %c0_48 = arith.constant 0 : index
    %c0_49 = arith.constant 0 : index
    %127 = vector.load %arg8[%c0_48, %c0_49] : memref<32x32xf32, #tpu.memory_space<vmem>>, vector<32x32xf32>
    %cst_50 = arith.constant dense<0.000000e+00> : vector<16x32xf32>
    %128 = tpu.matmul %126, %127, %cst_50 {dimension_numbers = #tpu.dot_dimension_numbers<[1], [0], [0], [1], [0, 0, 1, 1], [], []>} : vector<16x32xf32>, vector<32x32xf32>, vector<16x32xf32> -> vector<16x32xf32>
    %129 = vector.broadcast %7 : vector<1x32xf32> to vector<16x32xf32>
    %130 = arith.addf %128, %129 : vector<16x32xf32>
    %131 = vector.broadcast %9 : f32 to vector<16x32xf32>
    %132 = arith.mulf %131, %130 : vector<16x32xf32>
    %133 = arith.addf %132, %98 : vector<16x32xf32>
    %134 = vector.broadcast %2 : vector<16x1xf32> to vector<16x32xf32>
    %135 = arith.mulf %133, %134 : vector<16x32xf32>
    %c0_51 = arith.constant 0 : index
    %c0_52 = arith.constant 0 : index
    %136 = vector.load %arg10[%c0_51, %c0_52] : memref<16x32xf32, #tpu.memory_space<vmem>>, vector<16x32xf32>
    tpu.vector_store %arg10[%c0_51, %c0_52], %135 {strides = array<i32>} : memref<16x32xf32, #tpu.memory_space<vmem>>, vector<16x32xf32>,
    return
  }
}

</mosaic_0001>

<bundles_post_ra>
// kernel: tpu_custom_call.1
= control target key start
LH: loop header
LB: loop body
LE: loop exit
PB: predicated region body
PF: predicated region fallthrough
CT: control target
= control target key end

     0   :  { %18 = vsyncpa [#allocation3], 0  ;;  %s4726_s0 = inlined_call_operand.vmem [shape: f32[16,16], index: 0, kind: input, shape index: {}]   ;;  %s4727_s1 = inlined_call_operand.hbm [shape: f32[16,16], index: 1, kind: input, shape index: {}]   ;;  %s4728_s2 = inlined_call_operand.vmem [shape: f32[16,1], index: 2, kind: input, shape index: {}]   ;;  %s4729_s3 = inlined_call_operand.hbm [shape: f32[16,64], index: 3, kind: input, shape index: {}]   ;;  %s4730_s4 = inlined_call_operand.hbm [shape: f32[16,32], index: 4, kind: input, shape index: {}]   ;;  %s4731_s5 = inlined_call_operand.hbm [shape: f32[32,32], index: 5, kind: input, shape index: {}]   ;;  %s4732_s6 = inlined_call_operand.hbm [shape: f32[32,32], index: 6, kind: input, shape index: {}]   ;;  %s4733_s7 = inlined_call_operand.hbm [shape: f32[32,32], index: 7, kind: input, shape index: {}]   ;;  %s4734_s8 = inlined_call_operand.hbm [shape: f32[32,32], index: 8, kind: input, shape index: {}]   ;;  %s4735_s9 = inlined_call_operand.vmem [shape: f32[5,64], index: 9, kind: input, shape index: {}]   ;;  %s4736_s10 = inlined_call_operand.hbm [shape: f32[16,32], index: 10, kind: output, shape index: {0}]   ;;  %s4737_s11 = inlined_call_operand.hbm [shape: f32[16,32], index: 11, kind: output, shape index: {1}]   ;;  %s4738_s12 = inlined_call_operand.hbm [shape: f32[8,64], index: 12, kind: output, shape index: {2}]  }
   0x1   :  { %19 = vsyncpa [#allocation6], 0 }
   0x2   :  { %20 = vsyncpa [#allocation9], 0 }
   0x3   :  { %21 = vsyncpa [#allocation12], 0 }
   0x4   :  { %22 = vsyncpa [#allocation4], 0 }
   0x5   :  { %23 = vsyncpa [#allocation16], 0  ;;  %s4030_s21 = smov [#allocation5]   ;;  %s4031_s23 = smov [#allocation8]  }
   0x6   :  { %s45_s22 = sshll.u32 %s4030_s21, 4  ;;  %s69_s24 = sshll.u32 %s4031_s23, 4  ;;  %s46_s22 = int_to_ptr.vmem [resolvable:$true] %s45_s22  ;;  %s70_s24 = int_to_ptr.vmem [resolvable:$true] %s69_s24 }
   0x7   :  { %s3826_s25 = scalar_lea.vmem %s46_s22, 256  ;;  %p3831_p1 = scmp.lt.s32.totalorder %s46_s22, %s46_s22 }
   0x8   :  { %p3827_p0 = scmp.ne.s32.totalorder %s46_s22, %s3826_s25  ;;  %p3832_p2 = scmp.lt.s32.totalorder %s3826_s25, %s3826_s25 }
   0xa   :  { %p3833_p3 = por %p3832_p2, %p3831_p1 }
   0xc   :  { %p3834_p4 = pnand %p3833_p3, %p3827_p0 }
   0xe   :  { %3837 = shalt.err (!%p3834_p4)
}
   0xf   :  { %s4032_s26 = smov 128   ;;  %s4033_s27 = smov 8  }
  0x10   :  { %51 = dma.hbm_to_vmem [thread:$0]  %s4729_s3, 256, %s46_s22, [#allocation6], %s4032_s26, %s4032_s26, %s4033_s27  }
  0x11   :  { %s3846_s30 = scalar_lea.vmem %s70_s24, 512  ;;  %p3851_p6 = scmp.lt.s32.totalorder %s70_s24, %s70_s24 }
  0x12   :  { %p3847_p5 = scmp.ne.s32.totalorder %s70_s24, %s3846_s30  ;;  %p3852_p7 = scmp.lt.s32.totalorder %s3846_s30, %s3846_s30 }
  0x14   :  { %p3853_p8 = por %p3852_p7, %p3851_p6 }
  0x16   :  { %p3854_p9 = pnand %p3853_p8, %p3847_p5 }
  0x18   :  { %3857 = shalt.err (!%p3854_p9)
}
  0x19   :  { %75 = dma.hbm_to_vmem [thread:$0]  %s4731_s5, 512, %s70_s24, [#allocation9], %s4032_s26, %s4032_s26, %s4033_s27  }
  0x1a   :  { %s4034_s15 = smov [#allocation11]   ;;  %s4035_s17 = smov [#allocation2]  }
  0x1b   :  { %s93_s16 = sshll.u32 %s4034_s15, 4  ;;  %s31_s18 = sshll.u32 %s4035_s17, 4  ;;  %s94_s16 = int_to_ptr.vmem [resolvable:$true] %s93_s16  ;;  %s32_s18 = int_to_ptr.vmem [resolvable:$true] %s31_s18 }
  0x1c   :  { %s3866_s3 = scalar_lea.vmem %s94_s16, 512  ;;  %p3871_p11 = scmp.lt.s32.totalorder %s94_s16, %s94_s16 }
  0x1d   :  { %p3867_p10 = scmp.ne.s32.totalorder %s94_s16, %s3866_s3  ;;  %p3872_p12 = scmp.lt.s32.totalorder %s3866_s3, %s3866_s3 }
  0x1f   :  { %p3873_p13 = por %p3872_p12, %p3871_p11 }
  0x21   :  { %p3874_p0 = pnand %p3873_p13, %p3867_p10 }
  0x23   :  { %3877 = shalt.err (!%p3874_p0)
}
  0x24   :  { %99 = dma.hbm_to_vmem [thread:$0]  %s4733_s7, 512, %s94_s16, [#allocation12], %s4032_s26, %s4032_s26, %s4033_s27  }
  0x25   :  { %s3886_s5 = scalar_lea.vmem %s32_s18, 256  ;;  %p3891_p2 = scmp.lt.s32.totalorder %s32_s18, %s32_s18 }
  0x26   :  { %p3887_p1 = scmp.ne.s32.totalorder %s32_s18, %s3886_s5  ;;  %p3892_p3 = scmp.lt.s32.totalorder %s3886_s5, %s3886_s5 }
  0x28   :  { %p3893_p4 = por %p3892_p3, %p3891_p2 }
  0x2a   :  { %p3894_p5 = pnand %p3893_p4, %p3887_p1 }
  0x2c   :  { %3897 = shalt.err (!%p3894_p5)
}
  0x2d   :  { %37 = dma.hbm_to_vmem [thread:$0]  %s4727_s1, 256, %s32_s18, [#allocation3], %s4032_s26, %s4032_s26, %s4033_s27  }
  0x2e   :  { %s4036_s23 = smov [#allocation7]   ;;  %s4037_s25 = smov [#allocation10]  }
  0x2f   :  { %s57_s24 = sshll.u32 %s4036_s23, 4  ;;  %s81_s28 = sshll.u32 %s4037_s25, 4  ;;  %s58_s24 = int_to_ptr.vmem [resolvable:$true] %s57_s24  ;;  %s82_s28 = int_to_ptr.vmem [resolvable:$true] %s81_s28 }
  0x30   :  { %s3906_s7 = scalar_lea.vmem %s58_s24, 256  ;;  %p3911_p7 = scmp.lt.s32.totalorder %s58_s24, %s58_s24 }
  0x31   :  { %p3907_p6 = scmp.ne.s32.totalorder %s58_s24, %s3906_s7  ;;  %p3912_p8 = scmp.lt.s32.totalorder %s3906_s7, %s3906_s7 }
  0x33   :  { %p3913_p9 = por %p3912_p8, %p3911_p7 }
  0x35   :  { %p3914_p10 = pnand %p3913_p9, %p3907_p6 }
  0x37   :  { %3917 = shalt.err (!%p3914_p10)
}
  0x38   :  { %63 = dma.hbm_to_vmem [thread:$0]  %s4730_s4, 256, %s58_s24, [#allocation6], %s4032_s26, %s4032_s26, %s4033_s27  }
  0x39   :  { %s3926_s1 = scalar_lea.vmem %s82_s28, 512  ;;  %p3931_p12 = scmp.lt.s32.totalorder %s82_s28, %s82_s28 }
  0x3a   :  { %p3927_p11 = scmp.ne.s32.totalorder %s82_s28, %s3926_s1  ;;  %p3932_p13 = scmp.lt.s32.totalorder %s3926_s1, %s3926_s1 }
  0x3c   :  { %p3933_p0 = por %p3932_p13, %p3931_p12 }
  0x3e   :  { %p3934_p1 = pnand %p3933_p0, %p3927_p11 }
  0x40   :  { %3937 = shalt.err (!%p3934_p1)
}
  0x41   :  { %87 = dma.hbm_to_vmem [thread:$0]  %s4732_s6, 512, %s82_s28, [#allocation9], %s4032_s26, %s4032_s26, %s4033_s27  }
  0x42   :  { %s4038_s15 = smov [#allocation13]  }
  0x43   :  { %s105_s16 = sshll.u32 %s4038_s15, 4  ;;  %s106_s16 = int_to_ptr.vmem [resolvable:$true] %s105_s16 }
  0x44   :  { %s3946_s17 = scalar_lea.vmem %s106_s16, 512  ;;  %p3951_p3 = scmp.lt.s32.totalorder %s106_s16, %s106_s16 }
  0x45   :  { %p3947_p2 = scmp.ne.s32.totalorder %s106_s16, %s3946_s17  ;;  %p3952_p4 = scmp.lt.s32.totalorder %s3946_s17, %s3946_s17 }
  0x47   :  { %p3953_p5 = por %p3952_p4, %p3951_p3 }
  0x49   :  { %p3954_p6 = pnand %p3953_p5, %p3947_p2 }
  0x4b   :  { %3957 = shalt.err (!%p3954_p6)
}
  0x4c   :  { %111 = dma.hbm_to_vmem [thread:$0]  %s4734_s8, 512, %s106_s16, [#allocation12], %s4032_s26, %s4032_s26, %s4033_s27  }
  0x4d   :  { %4018 = dma.done.wait [#allocation3], 256  }
  0x4e   :  { %4019 = vsyncadd [#allocation3], 4294967040 }
  0x4f   :  { %4020 = dma.done.wait [#allocation6], 512  }
  0x50   :  { %4021 = vsyncadd [#allocation6], 4294966784 }
  0x51   :  { %4022 = dma.done.wait [#allocation9], 1024  }
  0x52   :  { %4023 = vsyncadd [#allocation9], 4294966272 }
  0x53   :  { %4024 = dma.done.wait [#allocation12], 1024  }
  0x54   :  { %4025 = vsyncadd [#allocation12], 4294966272  ;;  %vm144_vm0 = vcmask 130048   ;;  %v135_v0 = vld [vmem:[%s4726_s0] sm:$0xff]  ;;  %v136_v1 = vld [vmem:[%s4726_s0 + $0x8] sm:$0xff]  ;;  %v200_v30 = vlaneseq  ;;  %s4039_s5 = smov 112  }
  0x55   :  { %v145_v2 = vsel %vm144_vm0, %v135_v0, 0.0  ;;  %v148_v3 = vsel %vm144_vm0, %v136_v1, 0.0  ;;  %v199_v14 = vld [vmem:[#allocation5 + $0x8] sm:$0xff]  ;;  %v198_v15 = vld [vmem:[#allocation5] sm:$0xff]  ;;  %v137_v16 = vld [vmem:[#allocation2] sm:$0xff]  ;;  %s4040_s21 = smov 120  }
  0x56   :  { %146 = vadd.xlane.f32.xlu0 %v145_v2  ;;  %3596 = vmatprep.subr.mxu0 %v199_v14  ;;  %v138_v17 = vld [vmem:[#allocation2 + $0x8] sm:$0xff]  ;;  %v172_v18 = vsel %vm144_vm0, %v137_v16, 0.0  ;;  %v4179_v31 = vshrl.u32 %v200_v30, 7  ;;  %v4185_v33 = vld [vmem:[%s4735_s9] sm:$0x1f]  ;;  %s4041_s22 = smov 104  }
  0x57   :  { %3597 = vmatpush3.msra.mxu0 %v199_v14  ;;  %v175_v19 = vsel %vm144_vm0, %v138_v17, 0.0  ;;  %s4042_s23 = smov 96   ;;  %v286_v49 = vld [vmem:[#allocation7 + $0x8] sm:$0xff]  ;;  %v285_v50 = vld [vmem:[#allocation7] sm:$0xff]  ;;  %v4043_v51 = vmov 1983009808  }
  0x58   :  { %3598 = vmatprep.subr.mxu0 %v198_v15  ;;  %v202_v32 = vsub.s32 0, %v4179_v31  ;;  %3603 = vmatprep.subr.mxu1 %v286_v49  ;;  %v395_v52 = vunpack.c.l.s4 %v4043_v51  ;;  %v4044_v53 = vmov 1934713408   ;;  %v4045_v51 = vmov 0.0   ;;  %s4047_s24 = smov 16   ;;  %s4049_s7 = smov 24  }
  0x59   :  { %3599 = vmatpush3.msra.mxu0 %v198_v15  ;;  %3604 = vmatpush3.msra.mxu1 %v286_v49  ;;  %v427_v54 = vunpack.c.l.s4 %v4044_v53  ;;  %vm4046_vm1 = vmmov 0   ;;  %vm1258_vm2 = vcmask 64512   ;;  %vm2123_vm4 = vcmask 261120   ;;  %s4051_s1 = smov 40   ;;  %s4052_s13 = smov 56  }
  0x5a   :  { %149 = vadd.xlane.f32.xlu0 %v148_v3  ;;  %v203_v34 = vrot.slane %v4185_v33, %v202_v32  ;;  %3605 = vmatprep.subr.mxu1 %v285_v50  ;;  %v396_v55 = vunpack.c.0.s8 %v395_v52  ;;  %vm2121_vm5 = vcmask 195584   ;;  %s4053_s14 = smov 48   ;;  %vm2125_vm6 = vcmask 326656  }
  0x5b   :  { %3606 = vmatpush3.msra.mxu1 %v285_v50  ;;  %v428_v58 = vunpack.c.0.s8 %v427_v54  ;;  %3610 = vmatprep.subr.mxu0 %v4045_v51  ;;  %vm2127_vm7 = vcmask 392192   ;;  %vm2129_vm8 = vcmask 457728   ;;  %vm2131_vm9 = vcmask 523264  }
  0x5c   :  { %v4214_v59 = vsub.s32 %v396_v55, %v4179_v31  ;;  %3615 = vmatprep.subr.mxu1 %v4045_v51 }
  0x5d   :  { %v4218_v2 = vsub.s32 %v428_v58, %v4179_v31 }
  0x5e   :  { %173 = vadd.xlane.f32.xlu0 %v172_v18 }
  0xdf   :  { %v147_v4 = vpop.xlane.xlu0 %146 }
  0xe0   :  { %v152_v5 = vmul.f32 0.0625, %v147_v4 }
  0xe2   :  { %v154_v6 = vsub.f32 %v135_v0, %v152_v5 }
  0xe3   :  { %v150_v7 = vpop.xlane.xlu0 %149 }
  0xe4   :  { %v153_v8 = vmul.f32 0.0625, %v150_v7  ;;  %v156_v9 = vmul.f32 %v154_v6, %v154_v6 }
  0xe6   :  { %v155_v10 = vsub.f32 %v136_v1, %v153_v8  ;;  %v158_v11 = vsel %vm144_vm0, %v156_v9, 0.0 }
  0xe7   :  { %159 = vadd.xlane.f32.xlu1 %v158_v11  ;;  %v174_v39 = vpop.xlane.xlu0 %173 }
  0xe8   :  { %v157_v12 = vmul.f32 %v155_v10, %v155_v10  ;;  %v178_v40 = vmul.f32 0.0625, %v174_v39 }
  0xea   :  { %v161_v13 = vsel %vm144_vm0, %v157_v12, 0.0  ;;  %v4199_v41 = vsub.f32 %v137_v16, %v178_v40 }
  0xeb   :  { %162 = vadd.xlane.f32.xlu1 %v161_v13 }
  0xec   :  { %v182_v42 = vmul.f32 %v4199_v41, %v4199_v41 }
  0xee   :  { %v184_v44 = vsel %vm144_vm0, %v182_v42, 0.0 }
  0xef   :  { %176 = vadd.xlane.f32.xlu1 %v175_v19 }
 0x170   :  { %v160_v20 = vpop.xlane.xlu1 %159 }
 0x171   :  { %v164_v21 = vmul.f32 0.0625, %v160_v20 }
 0x173   :  { %v166_v22 = vadd.f32 1e-05, %v164_v21 }
 0x174   :  { %v163_v23 = vpop.xlane.xlu1 %162 }
 0x175   :  { %3765 = vrsqrt.f32 %v166_v22  ;;  %v165_v24 = vmul.f32 0.0625, %v163_v23 }
 0x177   :  { %v167_v25 = vadd.f32 1e-05, %v165_v24 }
 0x178   :  { %v177_v43 = vpop.xlane.xlu1 %176 }
 0x179   :  { %3767 = vrsqrt.f32 %v167_v25  ;;  %v179_v45 = vmul.f32 0.0625, %v177_v43 }
 0x17b   :  { %v4204_v46 = vsub.f32 %v138_v17, %v179_v45 }
 0x17d   :  { %v183_v47 = vmul.f32 %v4204_v46, %v4204_v46 }
 0x17f   :  { %v187_v48 = vsel %vm144_vm0, %v183_v47, 0.0 }
 0x182   :  { %v3766_v26 = vpop.eup %3765 }
 0x183   :  { %v170_v27 = vmul.f32 %v3766_v26, %v154_v6 }
 0x185   :  { %3600 = vmatprep.mubr.msk.f32.mxu0 %vm144_vm0, %v170_v27 }
 0x186   :  { %v3768_v28 = vpop.eup %3767 }
 0x187   :  { %v171_v29 = vmul.f32 %v3768_v28, %v155_v10 }
 0x189   :  { %3601 = vmatmul.mubr.msk.f32.vlgmr.msra.gmra.mxu0 %vm144_vm0, %v171_v29 }
 0x18a   :  { %3612 = vmatprep.mubr.msk.f32.mxu0 %vm4046_vm1, %v4045_v51 }
 0x249   :  { %v3602_v35 = vpop.f32.mrf.mxu0 }
 0x24a   :  { %v282_v36 = vadd.f32 %v3602_v35, %v203_v34 }
 0x24b   :  { %v276_v37 = vpop.f32.mrf.mxu0 }
 0x24c   :  { %382 = vrot.lane.b32.xlu0 %v282_v36, %s4039_s5  ;;  %376 = vrot.lane.b32.xlu1 %v282_v36, %s4040_s21  ;;  %v4190_v38 = vadd.f32 %v276_v37, %v203_v34 }
 0x250   :  { %388 = vrot.lane.b32.xlu1 %v282_v36, %s4041_s22  ;;  %374 = vrot.lane.b32.xlu0 %v4190_v38, %s4040_s21 }
 0x254   :  { %380 = vrot.lane.b32.xlu1 %v4190_v38, %s4039_s5 }
 0x258   :  { %386 = vrot.lane.b32.xlu1 %v4190_v38, %s4041_s22 }
 0x26f   :  { %185 = vadd.xlane.f32.xlu0 %v184_v44 }
 0x27c   :  { %188 = vadd.xlane.f32.xlu1 %v187_v48 }
 0x285   :  { %666 = vrot.lane.b32.xlu0 %v282_v36, %s4042_s23 }
 0x289   :  { %664 = vrot.lane.b32.xlu0 %v4190_v38, %s4042_s23 }
 0x2be   :  { %v377_v56 = vpop.permute.xlu1 %376  ;;  %v383_v57 = vpop.permute.xlu0 %382 }
 0x2bf   :  { %670 = vrot.lane.b32.xlu1 %v377_v56, %s4042_s23  ;;  %v460_v60 = vcombine.low %v282_v36, %v383_v57  ;;  %v461_v61 = vcombine.high %v282_v36, %v383_v57 }
 0x2c1   :  { %v468_v3 = vrot.slane %v460_v60, %v4214_v59  ;;  %v475_v4 = vrot.slane %v461_v61, %v4214_v59 }
 0x2c2   :  { %v389_v62 = vpop.permute.xlu1 %388  ;;  %v375_v63 = vpop.permute.xlu0 %374 }
 0x2c3   :  { %v476_v0 = vcombine.low %v377_v56, %v389_v62  ;;  %v477_v1 = vcombine.high %v377_v56, %v389_v62  ;;  %668 = vrot.lane.b32.xlu1 %v375_v63, %s4042_s23 }
 0x2c5   :  { %v484_v5 = vrot.slane %v476_v0, %v4214_v59  ;;  %v491_v6 = vrot.slane %v477_v1, %v4214_v59 }
 0x2c6   :  { %v381_v7 = vpop.permute.xlu1 %380 }
 0x2c7   :  { %v492_v8 = vcombine.low %v468_v3, %v484_v5  ;;  %v493_v9 = vcombine.high %v468_v3, %v484_v5  ;;  %v508_v10 = vcombine.low %v475_v4, %v491_v6  ;;  %v509_v11 = vcombine.high %v475_v4, %v491_v6  ;;  %672 = vrot.lane.b32.xlu0 %v381_v7, %s4042_s23 }
 0x2c8   :  { %v392_v16 = vcombine.low %v4190_v38, %v381_v7  ;;  %v393_v17 = vcombine.high %v4190_v38, %v381_v7 }
 0x2c9   :  { %v500_v12 = vrot.slane %v492_v8, %v4218_v2  ;;  %v507_v13 = vrot.slane %v493_v9, %v4218_v2  ;;  %v516_v14 = vrot.slane %v508_v10, %v4218_v2  ;;  %v523_v15 = vrot.slane %v509_v11, %v4218_v2 }
 0x2ca   :  { %v387_v18 = vpop.permute.xlu1 %386  ;;  %v400_v29 = vrot.slane %v392_v16, %v4214_v59  ;;  %v407_v32 = vrot.slane %v393_v17, %v4214_v59 }
 0x2cb   :  { %v596_v19 = vcombine.low %v500_v12, %v507_v13  ;;  %v3484_v20 = vcombine.high %v500_v12, %v507_v13  ;;  %v612_v21 = vcombine.low %v516_v14, %v523_v15  ;;  %v3485_v22 = vcombine.high %v516_v14, %v523_v15  ;;  %674 = vrot.lane.b32.xlu0 %v383_v57, %s4042_s23 }
 0x2cc   :  { %v408_v23 = vcombine.low %v375_v63, %v387_v18  ;;  %v409_v24 = vcombine.high %v375_v63, %v387_v18  ;;  %676 = vrot.lane.b32.xlu1 %v387_v18, %s4042_s23 }
 0x2cd   :  { %v603_v25 = vrot.slane %v596_v19, %v4214_v59  ;;  %v611_v26 = vrot.slane %v3484_v20, %v4214_v59  ;;  %v619_v27 = vrot.slane %v612_v21, %v4214_v59  ;;  %v627_v28 = vrot.slane %v3485_v22, %v4214_v59 }
 0x2ce   :  { %v416_v34 = vrot.slane %v408_v23, %v4214_v59  ;;  %v423_v35 = vrot.slane %v409_v24, %v4214_v59 }
 0x2cf   :  { %v628_v36 = vcombine.low %v603_v25, %v611_v26  ;;  %v629_v37 = vcombine.high %v603_v25, %v611_v26  ;;  %v644_v38 = vcombine.low %v619_v27, %v627_v28  ;;  %v645_v39 = vcombine.high %v619_v27, %v627_v28 }
 0x2d0   :  { %v424_v40 = vcombine.low %v400_v29, %v416_v34  ;;  %v425_v42 = vcombine.high %v400_v29, %v416_v34  ;;  %v440_v43 = vcombine.low %v407_v32, %v423_v35  ;;  %v441_v44 = vcombine.high %v407_v32, %v423_v35  ;;  %678 = vrot.lane.b32.xlu1 %v389_v62, %s4042_s23 }
 0x2d1   :  { %v4243_v45 = vrot.slane %v628_v36, %v4218_v2  ;;  %v4254_v52 = vrot.slane %v644_v38, %v4218_v2  ;;  %v4257_v53 = vrot.slane %v629_v37, %v4218_v2  ;;  %v4260_v54 = vrot.slane %v645_v39, %v4218_v2 }
 0x2d2   :  { %v432_v47 = vrot.slane %v424_v40, %v4218_v2  ;;  %v439_v48 = vrot.slane %v425_v42, %v4218_v2  ;;  %v448_v49 = vrot.slane %v440_v43, %v4218_v2  ;;  %v455_v50 = vrot.slane %v441_v44, %v4218_v2 }
 0x2d3   :  { %v660_v60 = vcombine.low %v4243_v45, %v4254_v52  ;;  %v661_v61 = vcombine.high %v4243_v45, %v4254_v52  ;;  %v662_v62 = vcombine.low %v4257_v53, %v4260_v54  ;;  %v663_v63 = vcombine.high %v4257_v53, %v4260_v54 }
 0x2d4   :  { %v528_v55 = vcombine.low %v432_v47, %v439_v48  ;;  %v3482_v56 = vcombine.high %v432_v47, %v439_v48  ;;  %v544_v57 = vcombine.low %v448_v49, %v455_v50  ;;  %v3483_v58 = vcombine.high %v448_v49, %v455_v50 }
 0x2d5   :  { %v1255_v52 = vand.u32 127, %v200_v30 }
 0x2d6   :  { %v535_v0 = vrot.slane %v528_v55, %v4214_v59  ;;  %v543_v1 = vrot.slane %v3482_v56, %v4214_v59  ;;  %v551_v3 = vrot.slane %v544_v57, %v4214_v59  ;;  %v559_v4 = vrot.slane %v3483_v58, %v4214_v59 }
 0x2d7   :  { %vm1256_vm3 = vcmp.eq.s32.totalorder %v4179_v31, %v1255_v52 }
 0x2d8   :  { %v560_v5 = vcombine.low %v535_v0, %v543_v1  ;;  %v561_v6 = vcombine.high %v535_v0, %v543_v1  ;;  %v576_v7 = vcombine.low %v551_v3, %v559_v4  ;;  %v577_v8 = vcombine.high %v551_v3, %v559_v4 }
 0x2da   :  { %v4275_v9 = vrot.slane %v560_v5, %v4218_v2  ;;  %v4278_v10 = vrot.slane %v576_v7, %v4218_v2  ;;  %v4281_v11 = vrot.slane %v561_v6, %v4218_v2  ;;  %v4284_v12 = vrot.slane %v577_v8, %v4218_v2 }
 0x2dc   :  { %v592_v13 = vcombine.low %v4275_v9, %v4278_v10  ;;  %v593_v14 = vcombine.high %v4275_v9, %v4278_v10  ;;  %v594_v15 = vcombine.low %v4281_v11, %v4284_v12  ;;  %v595_v16 = vcombine.high %v4281_v11, %v4284_v12 }
 0x2f8   :  { %v186_v17 = vpop.xlane.xlu0 %185 }
 0x2f9   :  { %v190_v18 = vmul.f32 0.0625, %v186_v17 }
 0x2fb   :  { %v192_v19 = vadd.f32 1e-05, %v190_v18 }
 0x2fc   :  { %v667_v27 = vpop.permute.xlu0 %666 }
 0x2fd   :  { %3769 = vrsqrt.f32 %v192_v19 }
 0x300   :  { %v665_v29 = vpop.permute.xlu0 %664 }
 0x305   :  { %v189_v20 = vpop.xlane.xlu1 %188 }
 0x306   :  { %v191_v21 = vmul.f32 0.0625, %v189_v20 }
 0x308   :  { %v193_v22 = vadd.f32 1e-05, %v191_v21 }
 0x30a   :  { %v3770_v23 = vpop.eup %3769  ;;  %3771 = vrsqrt.f32 %v193_v22 }
 0x30b   :  { %v196_v24 = vmul.f32 %v3770_v23, %v4199_v41 }
 0x30d   :  { %3607 = vmatprep.mubr.msk.f32.mxu1 %vm144_vm0, %v196_v24 }
 0x317   :  { %v3772_v25 = vpop.eup %3771 }
 0x318   :  { %v197_v26 = vmul.f32 %v3772_v25, %v4204_v46 }
 0x31a   :  { %3608 = vmatmul.mubr.msk.f32.vlgmr.msra.gmra.mxu1 %vm144_vm0, %v197_v26 }
 0x31b   :  { %3617 = vmatprep.mubr.msk.f32.mxu1 %vm4046_vm1, %v4045_v51 }
 0x331   :  { %v671_v28 = vpop.permute.xlu1 %670 }
 0x335   :  { %v669_v34 = vpop.permute.xlu1 %668 }
 0x339   :  { %v673_v32 = vpop.permute.xlu0 %672 }
 0x33a   :  { %v688_v35 = vcombine.low %v665_v29, %v673_v32  ;;  %v689_v36 = vcombine.high %v665_v29, %v673_v32 }
 0x33c   :  { %v696_v40 = vrot.slane %v688_v35, %v4214_v59  ;;  %v703_v46 = vrot.slane %v689_v36, %v4214_v59 }
 0x33d   :  { %v675_v39 = vpop.permute.xlu0 %674 }
 0x33e   :  { %v677_v37 = vpop.permute.xlu1 %676  ;;  %v756_v44 = vcombine.low %v667_v27, %v675_v39  ;;  %v757_v47 = vcombine.high %v667_v27, %v675_v39 }
 0x33f   :  { %v704_v38 = vcombine.low %v669_v34, %v677_v37  ;;  %v705_v41 = vcombine.high %v669_v34, %v677_v37 }
 0x340   :  { %v764_v5 = vrot.slane %v756_v44, %v4214_v59  ;;  %v771_v6 = vrot.slane %v757_v47, %v4214_v59 }
 0x341   :  { %v712_v42 = vrot.slane %v704_v38, %v4214_v59  ;;  %v719_v43 = vrot.slane %v705_v41, %v4214_v59 }
 0x342   :  { %v679_v48 = vpop.permute.xlu1 %678 }
 0x343   :  { %v720_v49 = vcombine.low %v696_v40, %v712_v42  ;;  %v721_v50 = vcombine.high %v696_v40, %v712_v42  ;;  %v736_v55 = vcombine.low %v703_v46, %v719_v43  ;;  %v737_v56 = vcombine.high %v703_v46, %v719_v43 }
 0x344   :  { %v772_v57 = vcombine.low %v671_v28, %v679_v48  ;;  %v773_v58 = vcombine.high %v671_v28, %v679_v48 }
 0x345   :  { %v728_v0 = vrot.slane %v720_v49, %v4218_v2  ;;  %v735_v1 = vrot.slane %v721_v50, %v4218_v2  ;;  %v744_v3 = vrot.slane %v736_v55, %v4218_v2  ;;  %v751_v4 = vrot.slane %v737_v56, %v4218_v2 }
 0x346   :  { %v780_v7 = vrot.slane %v772_v57, %v4214_v59  ;;  %v787_v8 = vrot.slane %v773_v58, %v4214_v59 }
 0x347   :  { %v824_v17 = vcombine.low %v728_v0, %v735_v1  ;;  %v3486_v18 = vcombine.high %v728_v0, %v735_v1  ;;  %v840_v19 = vcombine.low %v744_v3, %v751_v4  ;;  %v3487_v20 = vcombine.high %v744_v3, %v751_v4 }
 0x348   :  { %v788_v21 = vcombine.low %v764_v5, %v780_v7  ;;  %v789_v22 = vcombine.high %v764_v5, %v780_v7  ;;  %v804_v23 = vcombine.low %v771_v6, %v787_v8  ;;  %v805_v24 = vcombine.high %v771_v6, %v787_v8 }
 0x349   :  { %v831_v25 = vrot.slane %v824_v17, %v4214_v59  ;;  %v839_v26 = vrot.slane %v3486_v18, %v4214_v59  ;;  %v847_v27 = vrot.slane %v840_v19, %v4214_v59  ;;  %v855_v28 = vrot.slane %v3487_v20, %v4214_v59 }
 0x34a   :  { %v796_v29 = vrot.slane %v788_v21, %v4218_v2  ;;  %v803_v32 = vrot.slane %v789_v22, %v4218_v2  ;;  %v812_v34 = vrot.slane %v804_v23, %v4218_v2  ;;  %v819_v35 = vrot.slane %v805_v24, %v4218_v2 }
 0x34b   :  { %v856_v36 = vcombine.low %v831_v25, %v839_v26  ;;  %v872_v37 = vcombine.low %v847_v27, %v855_v28  ;;  %v857_v49 = vcombine.high %v831_v25, %v839_v26  ;;  %v873_v50 = vcombine.high %v847_v27, %v855_v28 }
 0x34c   :  { %v892_v38 = vcombine.low %v796_v29, %v803_v32  ;;  %v3488_v41 = vcombine.high %v796_v29, %v803_v32  ;;  %v908_v39 = vcombine.low %v812_v34, %v819_v35  ;;  %v3489_v40 = vcombine.high %v812_v34, %v819_v35 }
 0x34d   :  { %v864_v46 = vrot.slane %v856_v36, %v4218_v2  ;;  %v880_v42 = vrot.slane %v872_v37, %v4218_v2  ;;  %v871_v3 = vrot.slane %v857_v49, %v4218_v2  ;;  %v887_v4 = vrot.slane %v873_v50, %v4218_v2 }
 0x34e   :  { %v899_v43 = vrot.slane %v892_v38, %v4214_v59  ;;  %v907_v44 = vrot.slane %v3488_v41, %v4214_v59  ;;  %v915_v47 = vrot.slane %v908_v39, %v4214_v59  ;;  %v923_v48 = vrot.slane %v3489_v40, %v4214_v59 }
 0x34f   :  { %v888_v55 = vcombine.low %v864_v46, %v880_v42  ;;  %v889_v1 = vcombine.high %v864_v46, %v880_v42  ;;  %v890_v8 = vcombine.low %v871_v3, %v887_v4  ;;  %v891_v9 = vcombine.high %v871_v3, %v887_v4 }
 0x350   :  { %v924_v56 = vcombine.low %v899_v43, %v907_v44  ;;  %v940_v57 = vcombine.low %v915_v47, %v923_v48  ;;  %v925_v5 = vcombine.high %v899_v43, %v907_v44  ;;  %v941_v6 = vcombine.high %v915_v47, %v923_v48 }
 0x351   :  { %3611 = vmatpush3.xpose.msk.msra.mxu0 %vm1258_vm2, %v888_v55  ;;  %v289_v44 = vsub.s32 1, %v4179_v31 }
 0x352   :  { %3620 = vmatprep.subr.mxu0 %v4045_v51  ;;  %v932_v58 = vrot.slane %v924_v56, %v4218_v2  ;;  %v948_v0 = vrot.slane %v940_v57, %v4218_v2  ;;  %v955_v18 = vrot.slane %v941_v6, %v4218_v2 }
 0x353   :  { %v290_v47 = vrot.slane %v4185_v33, %v289_v44 }
 0x354   :  { %3613 = vmatmul.mubr.msk.f32.vlgmr.msra.gmra.mxu0 %vm1258_vm2, %v592_v13  ;;  %v956_v7 = vcombine.low %v932_v58, %v948_v0  ;;  %v957_v17 = vcombine.high %v932_v58, %v948_v0  ;;  %v939_v13 = vrot.slane %v925_v5, %v4218_v2 }
 0x355   :  { %3621 = vmatpush3.xpose.msk.msra.mxu0 %vm1258_vm2, %v889_v1  ;;  %3622 = vmatprep.mubr.msk.f32.mxu0 %vm4046_vm1, %v4045_v51 }
 0x356   :  { %3616 = vmatpush3.xpose.msk.msra.mxu1 %vm1258_vm2, %v956_v7  ;;  %3630 = vmatprep.subr.mxu0 %v4045_v51  ;;  %v959_v45 = vcombine.high %v939_v13, %v955_v18 }
 0x357   :  { %3625 = vmatprep.subr.mxu1 %v4045_v51 }
 0x358   :  { %3623 = vmatmul.mubr.msk.f32.vlgmr.msra.gmra.mxu0 %vm1258_vm2, %v593_v14 }
 0x359   :  { %3618 = vmatmul.mubr.msk.f32.vlgmr.msra.gmra.mxu1 %vm1258_vm2, %v660_v60  ;;  %3631 = vmatpush3.xpose.msk.msra.mxu0 %vm1258_vm2, %v890_v8  ;;  %v958_v60 = vcombine.low %v939_v13, %v955_v18 }
 0x35a   :  { %3626 = vmatpush3.xpose.msk.msra.mxu1 %vm1258_vm2, %v957_v17  ;;  %3627 = vmatprep.mubr.msk.f32.mxu1 %vm4046_vm1, %v4045_v51 }
 0x35b   :  { %3632 = vmatprep.mubr.msk.f32.mxu0 %vm4046_vm1, %v4045_v51  ;;  %3635 = vmatprep.subr.mxu1 %v4045_v51 }
 0x35c   :  { %3633 = vmatmul.mubr.msk.f32.vlgmr.msra.gmra.mxu0 %vm1258_vm2, %v594_v15  ;;  %3640 = vmatprep.subr.mxu0 %v4045_v51 }
 0x35d   :  { %3628 = vmatmul.mubr.msk.f32.vlgmr.msra.gmra.mxu1 %vm1258_vm2, %v661_v61  ;;  %3641 = vmatpush3.xpose.msk.msra.mxu0 %vm1258_vm2, %v891_v9  ;;  %v1257_v61 = vsel %vm1256_vm3, -1e+32, %v4045_v51 }
 0x35e   :  { %3636 = vmatpush3.xpose.msk.msra.mxu1 %vm1258_vm2, %v958_v60  ;;  %3637 = vmatprep.mubr.msk.f32.mxu1 %vm4046_vm1, %v4045_v51 }
 0x35f   :  { %3642 = vmatprep.mubr.msk.f32.mxu0 %vm4046_vm1, %v4045_v51  ;;  %3645 = vmatprep.subr.mxu1 %v4045_v51 }
 0x360   :  { %3643 = vmatmul.mubr.msk.f32.vlgmr.msra.gmra.mxu0 %vm1258_vm2, %v595_v16  ;;  %3650 = vmatprep.subr.mxu0 %v4045_v51 }
 0x361   :  { %3638 = vmatmul.mubr.msk.f32.vlgmr.msra.gmra.mxu1 %vm1258_vm2, %v662_v62  ;;  %3652 = vmatprep.mubr.msk.f32.mxu0 %vm4046_vm1, %v4045_v51 }
 0x362   :  { %3646 = vmatpush3.xpose.msk.msra.mxu1 %vm1258_vm2, %v959_v45  ;;  %3647 = vmatprep.mubr.msk.f32.mxu1 %vm4046_vm1, %v4045_v51 }
 0x363   :  { %3655 = vmatprep.subr.mxu1 %v4045_v51 }
 0x365   :  { %3648 = vmatmul.mubr.msk.f32.vlgmr.msra.gmra.mxu1 %vm1258_vm2, %v663_v63 }
 0x366   :  { %3657 = vmatprep.mubr.msk.f32.mxu1 %vm4046_vm1, %v4045_v51 }
 0x3da   :  { %v3609_v62 = vpop.f32.mrf.mxu1 }
 0x3db   :  { %v4417_v49 = vadd.f32 %v3609_v62, %v290_v47 }
 0x3dc   :  { %v363_v14 = vpop.f32.mrf.mxu1 }
 0x3dd   :  { %v4409_v48 = vadd.f32 %v363_v14, %v290_v47 }
 0x414   :  { %v1331_v10 = vpop.f32.mrf.mxu0 }
 0x415   :  { %v1332_v11 = vadd.f32 %v1331_v10, %v1257_v61 }
 0x416   :  { %v3614_v12 = vpop.f32.mrf.mxu0 }
 0x417   :  { %v1867_v15 = vsel %vm1258_vm2, %v1332_v11, -inf }
 0x418   :  { %1868 = vmax.xlane.f32.xlu0 %v1867_v15  ;;  %v1483_v53 = vpop.f32.mrf.mxu0 }
 0x419   :  { %v1407_v54 = vpop.f32.mrf.mxu1  ;;  %v1484_v25 = vadd.f32 %v1483_v53, %v1257_v61 }
 0x41a   :  { %v1408_v63 = vadd.f32 %v1407_v54, %v1257_v61  ;;  %v3624_v16 = vpop.f32.mrf.mxu0 }
 0x41b   :  { %v3619_v19 = vpop.f32.mrf.mxu1  ;;  %v1873_v36 = vsel %vm1258_vm2, %v1484_v25, -inf }
 0x41c   :  { %v1635_v20 = vpop.f32.mrf.mxu0  ;;  %v1870_v30 = vsel %vm1258_vm2, %v1408_v63, -inf }
 0x41d   :  { %1871 = vmax.xlane.f32.xlu1 %v1870_v30  ;;  %v1559_v21 = vpop.f32.mrf.mxu1  ;;  %v1636_v35 = vadd.f32 %v1635_v20, %v1257_v61 }
 0x41e   :  { %v1560_v22 = vadd.f32 %v1559_v21, %v1257_v61  ;;  %v3634_v23 = vpop.f32.mrf.mxu0 }
 0x41f   :  { %v3629_v24 = vpop.f32.mrf.mxu1  ;;  %v1879_v46 = vsel %vm1258_vm2, %v1636_v35, -inf }
 0x420   :  { %v1787_v26 = vpop.f32.mrf.mxu0  ;;  %v1876_v27 = vsel %vm1258_vm2, %v1560_v22, -inf }
 0x421   :  { %1877 = vmax.xlane.f32.xlu0 %v1876_v27  ;;  %v1711_v28 = vpop.f32.mrf.mxu1  ;;  %v1788_v40 = vadd.f32 %v1787_v26, %v1257_v61 }
 0x422   :  { %v1712_v29 = vadd.f32 %v1711_v28, %v1257_v61  ;;  %v3644_v32 = vpop.f32.mrf.mxu0 }
 0x423   :  { %v3639_v34 = vpop.f32.mrf.mxu1  ;;  %v1885_v43 = vsel %vm1258_vm2, %v1788_v40, -inf }
 0x424   :  { %v1882_v37 = vsel %vm1258_vm2, %v1712_v29, -inf }
 0x425   :  { %1874 = vmax.xlane.f32.xlu0 %v1873_v36  ;;  %1883 = vmax.xlane.f32.xlu1 %v1882_v37  ;;  %v1863_v38 = vpop.f32.mrf.mxu1 }
 0x426   :  { %v1864_v41 = vadd.f32 %v1863_v38, %v1257_v61 }
 0x427   :  { %v3649_v39 = vpop.f32.mrf.mxu1 }
 0x428   :  { %v1888_v42 = vsel %vm1258_vm2, %v1864_v41, -inf }
 0x429   :  { %1880 = vmax.xlane.f32.xlu0 %v1879_v46  ;;  %1889 = vmax.xlane.f32.xlu1 %v1888_v42 }
 0x42d   :  { %1886 = vmax.xlane.f32.xlu0 %v1885_v43 }
 0x43a   :  { %962 = vrot.lane.b32.xlu1 %v4409_v48, %s4040_s21 }
 0x43e   :  { %974 = vrot.lane.b32.xlu1 %v4409_v48, %s4041_s22 }
 0x443   :  { %968 = vrot.lane.b32.xlu0 %v4409_v48, %s4039_s5 }
 0x447   :  { %964 = vrot.lane.b32.xlu0 %v4417_v49, %s4040_s21 }
 0x44b   :  { %970 = vrot.lane.b32.xlu0 %v4417_v49, %s4039_s5 }
 0x44f   :  { %976 = vrot.lane.b32.xlu0 %v4417_v49, %s4041_s22 }
 0x4a1   :  { %v1869_v33 = vpop.xlane.xlu0 %1868 }
 0x4a2   :  { %v1891_v50 = vsub.f32 %v1332_v11, %v1869_v33 }
 0x4a4   :  { %v1899_v55 = vmul.f32 1.442695, %v1891_v50 }
 0x4a6   :  { %3773 = vpow2.f32 %v1899_v55  ;;  %v1872_v56 = vpop.xlane.xlu1 %1871 }
 0x4a7   :  { %v1892_v57 = vsub.f32 %v1408_v63, %v1872_v56 }
 0x4a9   :  { %v1901_v58 = vmul.f32 1.442695, %v1892_v57 }
 0x4aa   :  { %v1878_v0 = vpop.xlane.xlu0 %1877 }
 0x4ab   :  { %3775 = vpow2.f32 %v1901_v58  ;;  %v1894_v1 = vsub.f32 %v1560_v22, %v1878_v0 }
 0x4ad   :  { %v1905_v3 = vmul.f32 1.442695, %v1894_v1 }
 0x4ae   :  { %v1884_v4 = vpop.xlane.xlu1 %1883  ;;  %v1875_v5 = vpop.xlane.xlu0 %1874 }
 0x4af   :  { %3777 = vpow2.f32 %v1905_v3  ;;  %v1896_v6 = vsub.f32 %v1712_v29, %v1884_v4  ;;  %v1893_v7 = vsub.f32 %v1484_v25, %v1875_v5 }
 0x4b1   :  { %v1909_v8 = vmul.f32 1.442695, %v1896_v6  ;;  %v1903_v17 = vmul.f32 1.442695, %v1893_v7 }
 0x4b2   :  { %v1890_v13 = vpop.xlane.xlu1 %1889  ;;  %v1881_v18 = vpop.xlane.xlu0 %1880 }
 0x4b3   :  { %v4425_v9 = vpop.eup %3773  ;;  %3779 = vpow2.f32 %v1909_v8  ;;  %v1898_v60 = vsub.f32 %v1864_v41, %v1890_v13  ;;  %v1895_v45 = vsub.f32 %v1636_v35, %v1881_v18 }
 0x4b4   :  { %3781 = vpow2.f32 %v1903_v17  ;;  %v1915_v52 = vsel %vm1258_vm2, %v4425_v9, 0.0 }
 0x4b5   :  { %v1913_v61 = vmul.f32 1.442695, %v1898_v60  ;;  %v1907_v62 = vmul.f32 1.442695, %v1895_v45  ;;  %1916 = vadd.xlane.f32.xlu0 %v1915_v52 }
 0x4b6   :  { %v963_v10 = vpop.permute.xlu1 %962  ;;  %v1887_v11 = vpop.xlane.xlu0 %1886 }
 0x4b7   :  { %3783 = vpow2.f32 %v1913_v61  ;;  %v1897_v12 = vsub.f32 %v1788_v40, %v1887_v11 }
 0x4b8   :  { %v4429_v14 = vpop.eup %3775  ;;  %3785 = vpow2.f32 %v1907_v62 }
 0x4b9   :  { %v1911_v15 = vmul.f32 1.442695, %v1897_v12  ;;  %v1918_v53 = vsel %vm1258_vm2, %v4429_v14, 0.0 }
 0x4ba   :  { %1919 = vadd.xlane.f32.xlu1 %v1918_v53  ;;  %v975_v54 = vpop.permute.xlu1 %974  ;;  %v969_v63 = vpop.permute.xlu0 %968 }
 0x4bb   :  { %3787 = vpow2.f32 %v1911_v15  ;;  %v996_v16 = vcombine.low %v963_v10, %v975_v54  ;;  %v997_v19 = vcombine.high %v963_v10, %v975_v54  ;;  %v980_v20 = vcombine.low %v4409_v48, %v969_v63 }
 0x4bc   :  { %v4434_v30 = vpop.eup %3777  ;;  %v981_v21 = vcombine.high %v4409_v48, %v969_v63 }
 0x4bd   :  { %v1004_v22 = vrot.slane %v996_v16, %v4214_v59  ;;  %v1011_v23 = vrot.slane %v997_v19, %v4214_v59  ;;  %v988_v24 = vrot.slane %v980_v20, %v4214_v59  ;;  %v1924_v25 = vsel %vm1258_vm2, %v4434_v30, 0.0 }
 0x4be   :  { %v995_v26 = vrot.slane %v981_v21, %v4214_v59  ;;  %1925 = vadd.xlane.f32.xlu1 %v1924_v25  ;;  %v965_v27 = vpop.permute.xlu0 %964 }
 0x4bf   :  { %v1012_v28 = vcombine.low %v988_v24, %v1004_v22  ;;  %v1013_v29 = vcombine.high %v988_v24, %v1004_v22 }
 0x4c0   :  { %v4443_v32 = vpop.eup %3779  ;;  %v1028_v34 = vcombine.low %v995_v26, %v1011_v23  ;;  %v1029_v35 = vcombine.high %v995_v26, %v1011_v23 }
 0x4c1   :  { %v4445_v36 = vpop.eup %3781  ;;  %v1020_v37 = vrot.slane %v1012_v28, %v4218_v2  ;;  %v1027_v38 = vrot.slane %v1013_v29, %v4218_v2  ;;  %v1930_v41 = vsel %vm1258_vm2, %v4443_v32, 0.0 }
 0x4c2   :  { %v1036_v39 = vrot.slane %v1028_v34, %v4218_v2  ;;  %v1043_v40 = vrot.slane %v1029_v35, %v4218_v2  ;;  %1931 = vadd.xlane.f32.xlu1 %v1930_v41  ;;  %v1921_v46 = vsel %vm1258_vm2, %v4445_v36, 0.0  ;;  %v971_v42 = vpop.permute.xlu0 %970 }
 0x4c3   :  { %v1116_v43 = vcombine.low %v1020_v37, %v1027_v38  ;;  %v3490_v44 = vcombine.high %v1020_v37, %v1027_v38  ;;  %1922 = vadd.xlane.f32.xlu0 %v1921_v46  ;;  %v1048_v47 = vcombine.low %v4417_v49, %v971_v42  ;;  %v1049_v56 = vcombine.high %v4417_v49, %v971_v42 }
 0x4c4   :  { %v4456_v33 = vpop.eup %3783  ;;  %v1132_v50 = vcombine.low %v1036_v39, %v1043_v40  ;;  %v3491_v55 = vcombine.high %v1036_v39, %v1043_v40 }
 0x4c5   :  { %v4459_v57 = vpop.eup %3785  ;;  %v1123_v58 = vrot.slane %v1116_v43, %v4214_v59  ;;  %v1131_v0 = vrot.slane %v3490_v44, %v4214_v59  ;;  %v1056_v1 = vrot.slane %v1048_v47, %v4214_v59  ;;  %v1936_v5 = vsel %vm1258_vm2, %v4456_v33, 0.0 }
 0x4c6   :  { %v1139_v3 = vrot.slane %v1132_v50, %v4214_v59  ;;  %v1147_v4 = vrot.slane %v3491_v55, %v4214_v59  ;;  %v1927_v6 = vsel %vm1258_vm2, %v4459_v57, 0.0  ;;  %v977_v7 = vpop.permute.xlu0 %976  ;;  %1937 = vadd.xlane.f32.xlu1 %v1936_v5  ;;  %v1063_v60 = vrot.slane %v1049_v56, %v4214_v59 }
 0x4c7   :  { %1928 = vadd.xlane.f32.xlu0 %v1927_v6  ;;  %v1064_v8 = vcombine.low %v965_v27, %v977_v7  ;;  %v1065_v17 = vcombine.high %v965_v27, %v977_v7  ;;  %v1148_v13 = vcombine.low %v1123_v58, %v1131_v0  ;;  %v1149_v52 = vcombine.high %v1123_v58, %v1131_v0 }
 0x4c8   :  { %v4470_v18 = vpop.eup %3787  ;;  %v1164_v45 = vcombine.low %v1139_v3, %v1147_v4  ;;  %v1165_v61 = vcombine.high %v1139_v3, %v1147_v4 }
 0x4c9   :  { %v1072_v62 = vrot.slane %v1064_v8, %v4214_v59  ;;  %v1079_v10 = vrot.slane %v1065_v17, %v4214_v59  ;;  %v1933_v11 = vsel %vm1258_vm2, %v4470_v18, 0.0  ;;  %v1156_v12 = vrot.slane %v1148_v13, %v4218_v2 }
 0x4ca   :  { %v1172_v15 = vrot.slane %v1164_v45, %v4218_v2  ;;  %v4480_v53 = vrot.slane %v1149_v52, %v4218_v2  ;;  %v4483_v54 = vrot.slane %v1165_v61, %v4218_v2 }
 0x4cb   :  { %v1080_v63 = vcombine.low %v1056_v1, %v1072_v62  ;;  %v1081_v16 = vcombine.high %v1056_v1, %v1072_v62  ;;  %v1096_v19 = vcombine.low %v1063_v60, %v1079_v10  ;;  %v1097_v20 = vcombine.high %v1063_v60, %v1079_v10  ;;  %1934 = vadd.xlane.f32.xlu0 %v1933_v11 }
 0x4cc   :  { %v1180_v21 = vcombine.low %v1156_v12, %v1172_v15  ;;  %v1181_v22 = vcombine.high %v1156_v12, %v1172_v15  ;;  %v1182_v23 = vcombine.low %v4480_v53, %v4483_v54  ;;  %v1183_v24 = vcombine.high %v4480_v53, %v4483_v54 }
 0x4cd   :  { %v1088_v25 = vrot.slane %v1080_v63, %v4218_v2  ;;  %v1095_v26 = vrot.slane %v1081_v16, %v4218_v2  ;;  %v1104_v27 = vrot.slane %v1096_v19, %v4218_v2  ;;  %v1111_v28 = vrot.slane %v1097_v20, %v4218_v2 }
 0x4ce   :  { %3651 = vmatpush3.msra.mxu0 %v1180_v21 }
 0x4cf   :  { %v1184_v29 = vcombine.low %v1088_v25, %v1095_v26  ;;  %v3492_v34 = vcombine.high %v1088_v25, %v1095_v26  ;;  %v1200_v35 = vcombine.low %v1104_v27, %v1111_v28  ;;  %v3493_v37 = vcombine.high %v1104_v27, %v1111_v28  ;;  %3660 = vmatprep.subr.mxu0 %v4045_v51  ;;  %v3106_v27 = vld [vmem:[#allocation10 + $0x10] sm:$0xff] }
 0x4d1   :  { %v1191_v38 = vrot.slane %v1184_v29, %v4214_v59  ;;  %v1199_v41 = vrot.slane %v3492_v34, %v4214_v59  ;;  %v1207_v39 = vrot.slane %v1200_v35, %v4214_v59  ;;  %v1215_v40 = vrot.slane %v3493_v37, %v4214_v59 }
 0x4d3   :  { %v1216_v46 = vcombine.low %v1191_v38, %v1199_v41  ;;  %v1232_v42 = vcombine.low %v1207_v39, %v1215_v40  ;;  %v1217_v43 = vcombine.high %v1191_v38, %v1199_v41  ;;  %v1233_v44 = vcombine.high %v1207_v39, %v1215_v40  ;;  %v3104_v40 = vld [vmem:[#allocation10] sm:$0xff] }
 0x4d5   :  { %v1224_v47 = vrot.slane %v1216_v46, %v4218_v2  ;;  %v1240_v50 = vrot.slane %v1232_v42, %v4218_v2  ;;  %v1231_v55 = vrot.slane %v1217_v43, %v4218_v2  ;;  %v1247_v56 = vrot.slane %v1233_v44, %v4218_v2 }
 0x4d7   :  { %v1248_v58 = vcombine.low %v1224_v47, %v1240_v50  ;;  %v1249_v0 = vcombine.high %v1224_v47, %v1240_v50  ;;  %v1250_v1 = vcombine.low %v1231_v55, %v1247_v56  ;;  %v1251_v3 = vcombine.high %v1231_v55, %v1247_v56 }
 0x4d9   :  { %3656 = vmatpush3.msra.mxu1 %v1248_v58 }
 0x4da   :  { %3665 = vmatprep.subr.mxu1 %v4045_v51 }
 0x53e   :  { %v1917_v4 = vpop.xlane.xlu0 %1916 }
 0x53f   :  { %3789 = vrcp.f32 %v1917_v4 }
 0x543   :  { %v1920_v5 = vpop.xlane.xlu1 %1919 }
 0x544   :  { %3791 = vrcp.f32 %v1920_v5 }
 0x547   :  { %v1926_v6 = vpop.xlane.xlu1 %1925 }
 0x548   :  { %3793 = vrcp.f32 %v1926_v6 }
 0x54b   :  { %v1932_v7 = vpop.xlane.xlu1 %1931 }
 0x54c   :  { %v3790_v8 = vpop.eup %3789  ;;  %3795 = vrcp.f32 %v1932_v7  ;;  %v1923_v17 = vpop.xlane.xlu0 %1922 }
 0x54d   :  { %3797 = vrcp.f32 %v1923_v17  ;;  %v1940_v13 = vmul.f32 %v3790_v8, %v4425_v9 }
 0x54f   :  { %3653 = vmatmul.mubr.msk.f32.vlgmr.msra.gmra.mxu0 %vm1258_vm2, %v1940_v13  ;;  %v1938_v60 = vpop.xlane.xlu1 %1937 }
 0x550   :  { %v1929_v45 = vpop.xlane.xlu0 %1928  ;;  %3661 = vmatpush3.msra.mxu0 %v1181_v22  ;;  %3662 = vmatprep.mubr.msk.f32.mxu0 %vm4046_vm1, %v4045_v51  ;;  %3799 = vrcp.f32 %v1938_v60 }
 0x551   :  { %v3792_v52 = vpop.eup %3791  ;;  %3670 = vmatprep.subr.mxu0 %v4045_v51  ;;  %3801 = vrcp.f32 %v1929_v45 }
 0x552   :  { %v1942_v61 = vmul.f32 %v3792_v52, %v4429_v14 }
 0x554   :  { %v1935_v62 = vpop.xlane.xlu0 %1934  ;;  %3658 = vmatmul.mubr.msk.f32.vlgmr.msra.gmra.mxu1 %vm1258_vm2, %v1942_v61 }
 0x555   :  { %v3794_v10 = vpop.eup %3793  ;;  %3803 = vrcp.f32 %v1935_v62  ;;  %3666 = vmatpush3.msra.mxu1 %v1249_v0  ;;  %3667 = vmatprep.mubr.msk.f32.mxu1 %vm4046_vm1, %v4045_v51 }
 0x556   :  { %3675 = vmatprep.subr.mxu1 %v4045_v51  ;;  %v1946_v9 = vmul.f32 %v3794_v10, %v4434_v30  ;;  %v3107_v30 = vld [vmem:[#allocation10 + $0x18] sm:$0xff] }
 0x558   :  { %3668 = vmatmul.mubr.msk.f32.vlgmr.msra.gmra.mxu1 %vm1258_vm2, %v1946_v9  ;;  %v1971_v11 = vcombine.low %v1942_v61, %v1946_v9  ;;  %v1972_v12 = vcombine.high %v1942_v61, %v1946_v9 }
 0x559   :  { %v3796_v15 = vpop.eup %3795  ;;  %3676 = vmatpush3.msra.mxu1 %v1250_v1  ;;  %3677 = vmatprep.mubr.msk.f32.mxu1 %vm4046_vm1, %v4045_v51 }
 0x55a   :  { %v3798_v14 = vpop.eup %3797  ;;  %3685 = vmatprep.subr.mxu1 %v4045_v51  ;;  %v1950_v63 = vmul.f32 %v3796_v15, %v4443_v32  ;;  %v1979_v32 = vrot.slane %v1971_v11, %v4214_v59  ;;  %v1986_v28 = vrot.slane %v1972_v12, %v4214_v59 }
 0x55b   :  { %v1944_v16 = vmul.f32 %v3798_v14, %v4445_v36 }
 0x55c   :  { %3678 = vmatmul.mubr.msk.f32.vlgmr.msra.gmra.mxu1 %vm1258_vm2, %v1950_v63 }
 0x55d   :  { %3663 = vmatmul.mubr.msk.f32.vlgmr.msra.gmra.mxu0 %vm1258_vm2, %v1944_v16  ;;  %3686 = vmatpush3.msra.mxu1 %v1251_v3  ;;  %v1955_v19 = vcombine.low %v1940_v13, %v1944_v16  ;;  %v1956_v20 = vcombine.high %v1940_v13, %v1944_v16  ;;  %v3800_v21 = vpop.eup %3799 }
 0x55e   :  { %3671 = vmatpush3.msra.mxu0 %v1182_v23  ;;  %3672 = vmatprep.mubr.msk.f32.mxu0 %vm4046_vm1, %v4045_v51  ;;  %v3802_v22 = vpop.eup %3801  ;;  %v1954_v36 = vmul.f32 %v3800_v21, %v4456_v33  ;;  %v3105_v33 = vld [vmem:[#allocation10 + $0x8] sm:$0xff] }
 0x55f   :  { %3680 = vmatprep.subr.mxu0 %v4045_v51  ;;  %3687 = vmatprep.mubr.msk.f32.mxu1 %vm4046_vm1, %v4045_v51  ;;  %v1963_v25 = vrot.slane %v1955_v19, %v4214_v59  ;;  %v1970_v26 = vrot.slane %v1956_v20, %v4214_v59  ;;  %v1948_v23 = vmul.f32 %v3802_v22, %v4459_v57 }
 0x560   :  { %3701 = vmatprep.subr.mxu1 %v3107_v30  ;;  %3688 = vmatmul.mubr.msk.f32.vlgmr.msra.gmra.mxu1 %vm1258_vm2, %v1954_v36  ;;  %v2003_v29 = vcombine.low %v1950_v63, %v1954_v36  ;;  %v2004_v37 = vcombine.high %v1950_v63, %v1954_v36 }
 0x561   :  { %v2019_v34 = vcombine.low %v1963_v25, %v1979_v32  ;;  %v2020_v35 = vcombine.high %v1963_v25, %v1979_v32  ;;  %3673 = vmatmul.mubr.msk.f32.vlgmr.msra.gmra.mxu0 %vm1258_vm2, %v1948_v23  ;;  %3702 = vmatpush3.msra.mxu1 %v3107_v30  ;;  %v2035_v41 = vcombine.low %v1970_v26, %v1986_v28 }
 0x562   :  { %v3804_v38 = vpop.eup %3803  ;;  %v2036_v39 = vcombine.high %v1970_v26, %v1986_v28  ;;  %3681 = vmatpush3.msra.mxu0 %v1183_v24  ;;  %3703 = vmatprep.subr.mxu1 %v3106_v27  ;;  %v2011_v54 = vrot.slane %v2003_v29, %v4214_v59 }
 0x563   :  { %v1952_v57 = vmul.f32 %v3804_v38, %v4470_v18  ;;  %3709 = vmatprep.mubr.msk.f32.mxu1 %vm2123_vm4, %v4409_v48  ;;  %3704 = vmatpush3.msra.mxu1 %v3106_v27  ;;  %v2018_v48 = vrot.slane %v2004_v37, %v4214_v59  ;;  %v4554_v47 = vrot.slane %v2019_v34, %v4218_v2 }
 0x564   :  { %3682 = vmatprep.mubr.msk.f32.mxu0 %vm4046_vm1, %v4045_v51  ;;  %3705 = vmatprep.subr.mxu1 %v3105_v33  ;;  %v4557_v50 = vrot.slane %v2020_v35, %v4218_v2  ;;  %v4560_v55 = vrot.slane %v2035_v41, %v4218_v2  ;;  %v4575_v1 = vrot.slane %v2036_v39, %v4218_v2 }
 0x565   :  { %v1987_v46 = vcombine.low %v1948_v23, %v1952_v57  ;;  %v1988_v42 = vcombine.high %v1948_v23, %v1952_v57  ;;  %3683 = vmatmul.mubr.msk.f32.vlgmr.msra.gmra.mxu0 %vm1258_vm2, %v1952_v57  ;;  %3706 = vmatpush3.msra.mxu1 %v3105_v33 }
 0x566   :  { %3707 = vmatprep.subr.mxu1 %v3104_v40 }
 0x567   :  { %v1995_v53 = vrot.slane %v1987_v46, %v4214_v59  ;;  %v2002_v18 = vrot.slane %v1988_v42, %v4214_v59  ;;  %3708 = vmatpush3.msra.mxu1 %v3104_v40 }
 0x568   :  { %3710 = vmatmul.mubr.msk.f32.vlgmr.msra.gmra.mxu1 %vm2123_vm4, %v4417_v49 }
 0x569   :  { %v2051_v51 = vcombine.low %v1995_v53, %v2011_v54  ;;  %v2052_v24 = vcombine.high %v1995_v53, %v2011_v54  ;;  %v2067_v43 = vcombine.low %v2002_v18, %v2018_v48  ;;  %v2068_v44 = vcombine.high %v2002_v18, %v2018_v48 }
 0x56b   :  { %v4563_v56 = vrot.slane %v2051_v51, %v4218_v2  ;;  %v4566_v58 = vrot.slane %v2052_v24, %v4218_v2  ;;  %v4569_v49 = vrot.slane %v2067_v43, %v4218_v2  ;;  %v4572_v0 = vrot.slane %v2068_v44, %v4218_v2 }
 0x56d   :  { %v2083_v3 = vcombine.low %v4554_v47, %v4563_v56  ;;  %v2084_v4 = vcombine.high %v4554_v47, %v4563_v56  ;;  %v2086_v5 = vcombine.high %v4557_v50, %v4566_v58  ;;  %v2087_v6 = vcombine.low %v4560_v55, %v4569_v49 }
 0x56e   :  { %v2088_v7 = vcombine.high %v4560_v55, %v4569_v49  ;;  %v2090_v8 = vcombine.high %v4575_v1, %v4572_v0  ;;  %v2085_v17 = vcombine.low %v4557_v50, %v4566_v58  ;;  %v2089_v13 = vcombine.low %v4575_v1, %v4572_v0  ;;  %v3231_v49 = vld [vmem:[#allocation11 + $0x18] sm:$0xff] }
 0x60f   :  { %v2202_v60 = vpop.f32.mrf.mxu0 }
 0x611   :  { %v3654_v45 = vpop.f32.mrf.mxu0 }
 0x614   :  { %v2275_v52 = vpop.f32.mrf.mxu1 }
 0x616   :  { %v3659_v61 = vpop.f32.mrf.mxu1 }
 0x618   :  { %v2421_v62 = vpop.f32.mrf.mxu1 }
 0x61a   :  { %v3669_v10 = vpop.f32.mrf.mxu1 }
 0x61c   :  { %v2567_v9 = vpop.f32.mrf.mxu1 }
 0x61d   :  { %v2348_v11 = vpop.f32.mrf.mxu0  ;;  %v2785_v14 = vcombine.low %v2275_v52, %v2567_v9  ;;  %v2786_v63 = vcombine.high %v2275_v52, %v2567_v9 }
 0x61e   :  { %v3679_v12 = vpop.f32.mrf.mxu1 }
 0x61f   :  { %v3664_v15 = vpop.f32.mrf.mxu0  ;;  %v2793_v32 = vrot.slane %v2785_v14, %v4214_v59  ;;  %v2800_v22 = vrot.slane %v2786_v63, %v4214_v59 }
 0x620   :  { %v2713_v16 = vpop.f32.mrf.mxu1 }
 0x621   :  { %v2494_v30 = vpop.f32.mrf.mxu0  ;;  %v2801_v19 = vcombine.low %v2421_v62, %v2713_v16  ;;  %v2802_v20 = vcombine.high %v2421_v62, %v2713_v16 }
 0x622   :  { %v3689_v21 = vpop.f32.mrf.mxu1  ;;  %v2717_v23 = vcombine.low %v2202_v60, %v2494_v30  ;;  %v2718_v27 = vcombine.high %v2202_v60, %v2494_v30 }
 0x623   :  { %v2809_v36 = vrot.slane %v2801_v19, %v4214_v59  ;;  %v2816_v25 = vrot.slane %v2802_v20, %v4214_v59  ;;  %v3674_v26 = vpop.f32.mrf.mxu0 }
 0x624   :  { %v2725_v42 = vrot.slane %v2717_v23, %v4214_v59  ;;  %v2732_v53 = vrot.slane %v2718_v27, %v4214_v59 }
 0x625   :  { %v2817_v28 = vcombine.low %v2793_v32, %v2809_v36  ;;  %v2818_v29 = vcombine.high %v2793_v32, %v2809_v36  ;;  %v2833_v34 = vcombine.low %v2800_v22, %v2816_v25  ;;  %v2834_v35 = vcombine.high %v2800_v22, %v2816_v25  ;;  %v2640_v37 = vpop.f32.mrf.mxu0 }
 0x626   :  { %v2733_v38 = vcombine.low %v2348_v11, %v2640_v37  ;;  %v2734_v33 = vcombine.high %v2348_v11, %v2640_v37 }
 0x627   :  { %v2825_v41 = vrot.slane %v2817_v28, %v4218_v2  ;;  %v2832_v39 = vrot.slane %v2818_v29, %v4218_v2  ;;  %v2841_v57 = vrot.slane %v2833_v34, %v4218_v2  ;;  %v2848_v40 = vrot.slane %v2834_v35, %v4218_v2  ;;  %v3684_v46 = vpop.f32.mrf.mxu0  ;;  %v3022_v29 = vld [vmem:[#allocation8 + $0x18] sm:$0xff]  ;;  %v3021_v34 = vld [vmem:[#allocation8 + $0x10] sm:$0xff] }
 0x628   :  { %v2741_v54 = vrot.slane %v2733_v38, %v4214_v59  ;;  %v2748_v18 = vrot.slane %v2734_v33, %v4214_v59  ;;  %v3711_v48 = vpop.f32.mrf.mxu1  ;;  %3690 = vmatprep.subr.mxu0 %v3022_v29 }
 0x629   :  { %v2921_v51 = vcombine.low %v2825_v41, %v2832_v39  ;;  %v3520_v24 = vcombine.high %v2825_v41, %v2832_v39  ;;  %v2937_v43 = vcombine.low %v2841_v57, %v2848_v40  ;;  %v3521_v44 = vcombine.high %v2841_v57, %v2848_v40  ;;  %3188 = vst.msk [vmem:[#allocation15 + $0x8] sm:$0xff] %vm2123_vm4, %v3711_v48  ;;  %v3019_v48 = vld [vmem:[#allocation8] sm:$0xff] }
 0x62a   :  { %v2749_v60 = vcombine.low %v2725_v42, %v2741_v54  ;;  %v2750_v45 = vcombine.high %v2725_v42, %v2741_v54  ;;  %v2765_v52 = vcombine.low %v2732_v53, %v2748_v18  ;;  %v2766_v61 = vcombine.high %v2732_v53, %v2748_v18  ;;  %v3178_v62 = vpop.f32.mrf.mxu1  ;;  %3691 = vmatpush3.msra.mxu0 %v3022_v29  ;;  %v3020_v54 = vld [vmem:[#allocation8 + $0x8] sm:$0xff] }
 0x62b   :  { %3187 = vst.msk [vmem:[#allocation15] sm:$0xff] %vm2123_vm4, %v3178_v62  ;;  %v2928_v10 = vrot.slane %v2921_v51, %v4214_v59  ;;  %v2936_v9 = vrot.slane %v3520_v24, %v4214_v59  ;;  %v2944_v11 = vrot.slane %v2937_v43, %v4214_v59  ;;  %v2952_v12 = vrot.slane %v3521_v44, %v4214_v59  ;;  %v140_v62 = vld [vmem:[%s4728_s2 + $0x8] sm:$0xff] }
 0x62c   :  { %v2757_v15 = vrot.slane %v2749_v60, %v4218_v2  ;;  %v2764_v14 = vrot.slane %v2750_v45, %v4218_v2  ;;  %v2773_v63 = vrot.slane %v2765_v52, %v4218_v2  ;;  %v2780_v16 = vrot.slane %v2766_v61, %v4218_v2  ;;  %3692 = vmatprep.subr.mxu0 %v3021_v34  ;;  %v139_v60 = vld [vmem:[%s4728_s2] sm:$0xff]  ;;  %s4050_s2 = smov 32  }
 0x62d   :  { %v2954_v30 = vcombine.high %v2928_v10, %v2936_v9  ;;  %v2970_v19 = vcombine.high %v2944_v11, %v2952_v12  ;;  %v2953_v20 = vcombine.low %v2928_v10, %v2936_v9  ;;  %v2969_v21 = vcombine.low %v2944_v11, %v2952_v12  ;;  %3693 = vmatpush3.msra.mxu0 %v3021_v34 }
 0x62e   :  { %v2853_v32 = vcombine.low %v2757_v15, %v2764_v14  ;;  %v3518_v22 = vcombine.high %v2757_v15, %v2764_v14  ;;  %v2869_v36 = vcombine.low %v2773_v63, %v2780_v16  ;;  %v3519_v25 = vcombine.high %v2773_v63, %v2780_v16  ;;  %3694 = vmatprep.subr.mxu0 %v3020_v54 }
 0x62f   :  { %v2968_v26 = vrot.slane %v2954_v30, %v4218_v2  ;;  %v2984_v23 = vrot.slane %v2970_v19, %v4218_v2  ;;  %v2961_v27 = vrot.slane %v2953_v20, %v4218_v2  ;;  %v2977_v28 = vrot.slane %v2969_v21, %v4218_v2  ;;  %3695 = vmatpush3.msra.mxu0 %v3020_v54 }
 0x630   :  { %v2860_v35 = vrot.slane %v2853_v32, %v4214_v59  ;;  %v2868_v37 = vrot.slane %v3518_v22, %v4214_v59  ;;  %v2876_v38 = vrot.slane %v2869_v36, %v4214_v59  ;;  %v2884_v33 = vrot.slane %v3519_v25, %v4214_v59  ;;  %3696 = vmatprep.subr.mxu0 %v3019_v48 }
 0x631   :  { %v2987_v41 = vcombine.low %v2968_v26, %v2984_v23  ;;  %v2986_v39 = vcombine.high %v2961_v27, %v2977_v28  ;;  %v2985_v57 = vcombine.low %v2961_v27, %v2977_v28  ;;  %3697 = vmatpush3.msra.mxu0 %v3019_v48  ;;  %v4048_v45 = vmov 0  }
 0x632   :  { %v2885_v40 = vcombine.low %v2860_v35, %v2868_v37  ;;  %v2901_v46 = vcombine.low %v2876_v38, %v2884_v33  ;;  %v2886_v42 = vcombine.high %v2860_v35, %v2868_v37  ;;  %v2902_v53 = vcombine.high %v2876_v38, %v2884_v33  ;;  %3764 = vset.pattern.permute.xlu1 %v4048_v45 }
 0x633   :  { %3001 = vrot.lane.b32.xlu1 %v2987_v41, %s4047_s24  ;;  %2993 = vrot.lane.b32.xlu0 %v2986_v39, %s4033_s27  ;;  %v3228_v41 = vld [vmem:[#allocation11] sm:$0xff] }
 0x634   :  { %v2893_v18 = vrot.slane %v2885_v40, %v4218_v2  ;;  %v2909_v59 = vrot.slane %v2901_v46, %v4218_v2  ;;  %v2900_v43 = vrot.slane %v2886_v42, %v4218_v2  ;;  %v2916_v44 = vrot.slane %v2902_v53, %v4218_v2  ;;  %3763 = vset.pattern.permute.xlu0 %v4048_v45  ;;  %v3334_v45 = vld [vmem:[#allocation13 + $0x18] sm:$0xff] }
 0x635   :  { %v2988_v2 = vcombine.high %v2968_v26, %v2984_v23  ;;  %3712 = vmatprep.subr.mxu0 %v3231_v49  ;;  %3723 = vmatprep.subr.mxu1 %v3334_v45 }
 0x636   :  { %v2918_v51 = vcombine.high %v2893_v18, %v2909_v59  ;;  %v2917_v24 = vcombine.low %v2893_v18, %v2909_v59  ;;  %v2919_v52 = vcombine.low %v2900_v43, %v2916_v44  ;;  %v2920_v61 = vcombine.high %v2900_v43, %v2916_v44  ;;  %3724 = vmatpush3.msra.mxu1 %v3334_v45 }
 0x637   :  { %3191 = vperm.xlu0 %3763, %v139_v60  }
 0x638   :  { %2991 = vrot.lane.b32.xlu1 %v2918_v51, %s4033_s27 }
 0x63c   :  { %2999 = vrot.lane.b32.xlu1 %v2919_v52, %s4047_s24  ;;  %v3333_v52 = vld [vmem:[#allocation13 + $0x10] sm:$0xff] }
 0x63d   :  { %3725 = vmatprep.subr.mxu1 %v3333_v52 }
 0x63e   :  { %3726 = vmatpush3.msra.mxu1 %v3333_v52 }
 0x640   :  { %3007 = vrot.lane.b32.xlu1 %v2920_v61, %s4049_s7  ;;  %v3332_v61 = vld [vmem:[#allocation13 + $0x8] sm:$0xff] }
 0x641   :  { %3727 = vmatprep.subr.mxu1 %v3332_v61 }
 0x642   :  { %3728 = vmatpush3.msra.mxu1 %v3332_v61 }
 0x644   :  { %3009 = vrot.lane.b32.xlu1 %v2988_v2, %s4049_s7  ;;  %v3331_v2 = vld [vmem:[#allocation13] sm:$0xff] }
 0x645   :  { %3729 = vmatprep.subr.mxu1 %v3331_v2 }
 0x646   :  { %3730 = vmatpush3.msra.mxu1 %v3331_v2 }
 0x648   :  { %3196 = vperm.xlu1 %3764, %v140_v62   ;;  %v3817_v62 = vld [vmem:[%s4735_s9] sm:$0x1f]  ;;  %s4054_s9 = smov [#allocation15]  }
 0x649   :  { %s3446_s17 = sshll.u32 %s4054_s9, 4  ;;  %s3447_s17 = int_to_ptr.vmem [resolvable:$true] %s3446_s17 }
 0x64a   :  { %s3958_s4 = scalar_lea.vmem %s3447_s17, 256  ;;  %p3963_p8 = scmp.lt.s32.totalorder %s3447_s17, %s3447_s17 }
 0x64b   :  { %p3959_p7 = scmp.ne.s32.totalorder %s3447_s17, %s3958_s4  ;;  %p3964_p9 = scmp.lt.s32.totalorder %s3958_s4, %s3958_s4 }
 0x64d   :  { %p3965_p10 = por %p3964_p9, %p3963_p8 }
 0x64f   :  { %p3966_p11 = pnand %p3965_p10, %p3959_p7 }
 0x6a5   :  { %v3002_v10 = vpop.permute.xlu1 %3001  ;;  %v2994_v12 = vpop.permute.xlu0 %2993 }
 0x6a6   :  { %v3014_v16 = vsel %vm1258_vm2, %v2985_v57, %v2994_v12 }
 0x6a7   :  { %v3016_v20 = vsel %vm144_vm0, %v3014_v16, %v3002_v10  ;;  %v142_v10 = vrot.slane %v3817_v62, 4 }
 0x6a9   :  { %3734 = vpush %v142_v10 }
 0x6aa   :  { %v2992_v9 = vpop.permute.xlu1 %2991 }
 0x6ab   :  { %v3013_v15 = vsel %vm1258_vm2, %v2917_v24, %v2992_v9  ;;  %v3234_v9 = vsub.s32 2, %v4179_v31 }
 0x6ae   :  { %v3000_v11 = vpop.permute.xlu1 %2999 }
 0x6af   :  { %v3015_v14 = vsel %vm144_vm0, %v3013_v15, %v3000_v11  ;;  %v3235_v11 = vrot.slane %v3817_v62, %v3234_v9 }
 0x6b2   :  { %v3008_v63 = vpop.permute.xlu1 %3007  ;;  %v4649_v36 = vpop.permute.xlu0 %3191 }
 0x6b3   :  { %v3017_v30 = vsel %vm2121_vm5, %v3015_v14, %v3008_v63 }
 0x6b4   :  { %3698 = vmatprep.mubr.msk.f32.mxu0 %vm2123_vm4, %v3017_v30 }
 0x6b6   :  { %v3010_v19 = vpop.permute.xlu1 %3009 }
 0x6b7   :  { %v3018_v21 = vsel %vm2121_vm5, %v3016_v20, %v3010_v19 }
 0x6b8   :  { %3699 = vmatmul.mubr.msk.f32.vlgmr.msra.gmra.mxu0 %vm2123_vm4, %v3018_v21 }
 0x6b9   :  { %3713 = vmatpush3.msra.mxu0 %v3231_v49 }
 0x6c3   :  { %v4647_v32 = vpop.permute.xlu1 %3196 }
 0x778   :  { %v3700_v22 = vpop.f32.mrf.mxu0 }
 0x779   :  { %v4652_v25 = vmul.f32 %v3700_v22, %v4647_v32 }
 0x77a   :  { %v3095_v26 = vpop.f32.mrf.mxu0 }
 0x77b   :  { %v4655_v23 = vmul.f32 %v4649_v36, %v3095_v26  ;;  %v3204_v27 = vsel %vm2123_vm4, %v4652_v25, 0.0 }
 0x77c   :  { %3205 = vadd.xlane.f32.xlu0 %v3204_v27 }
 0x77d   :  { %v3201_v28 = vsel %vm2123_vm4, %v4655_v23, 0.0 }
 0x77e   :  { %3202 = vadd.xlane.f32.xlu1 %v3201_v28 }
 0x78f   :  { %2092 = vrot.lane.b32.xlu1 %v2084_v4, %s4033_s27 }
 0x793   :  { %2100 = vrot.lane.b32.xlu1 %v2086_v5, %s4049_s7 }
 0x797   :  { %2104 = vrot.lane.b32.xlu1 %v2087_v6, %s4050_s2 }
 0x79b   :  { %2108 = vrot.lane.b32.xlu1 %v2088_v7, %s4051_s1  ;;  %v3230_v7 = vld [vmem:[#allocation11 + $0x10] sm:$0xff] }
 0x79c   :  { %3714 = vmatprep.subr.mxu0 %v3230_v7 }
 0x79d   :  { %3715 = vmatpush3.msra.mxu0 %v3230_v7 }
 0x79f   :  { %2116 = vrot.lane.b32.xlu1 %v2090_v8, %s4052_s13  ;;  %v3229_v8 = vld [vmem:[#allocation11 + $0x8] sm:$0xff] }
 0x7a0   :  { %3716 = vmatprep.subr.mxu0 %v3229_v8 }
 0x7a1   :  { %3717 = vmatpush3.msra.mxu0 %v3229_v8 }
 0x7a2   :  { %3718 = vmatprep.subr.mxu0 %v3228_v41 }
 0x7a3   :  { %3719 = vmatpush3.msra.mxu0 %v3228_v41 }
 0x805   :  { %v3206_v4 = vpop.xlane.xlu0 %3205 }
 0x806   :  { %v3209_v29 = vmul.f32 0.03125, %v3206_v4 }
 0x807   :  { %v3203_v34 = vpop.xlane.xlu1 %3202 }
 0x808   :  { %v3208_v35 = vmul.f32 0.03125, %v3203_v34  ;;  %v3211_v5 = vsub.f32 %v4652_v25, %v3209_v29 }
 0x80a   :  { %v3210_v37 = vsub.f32 %v4655_v23, %v3208_v35  ;;  %v3213_v33 = vmul.f32 %v3211_v5, %v3211_v5 }
 0x80b   :  { %v2093_v39 = vpop.permute.xlu1 %2092 }
 0x80c   :  { %v3212_v38 = vmul.f32 %v3210_v37, %v3210_v37  ;;  %v3217_v55 = vsel %vm2123_vm4, %v3213_v33, 0.0  ;;  %v2119_v0 = vsel %vm1258_vm2, %v2083_v3, %v2093_v39 }
 0x80e   :  { %v3214_v6 = vsel %vm2123_vm4, %v3212_v38, 0.0 }
 0x80f   :  { %3215 = vadd.xlane.f32.xlu0 %v3214_v6  ;;  %v2101_v57 = vpop.permute.xlu1 %2100 }
 0x813   :  { %3218 = vadd.xlane.f32.xlu0 %v3217_v55  ;;  %v2105_v46 = vpop.permute.xlu1 %2104 }
 0x829   :  { %2096 = vrot.lane.b32.xlu0 %v2085_v17, %s4047_s24  ;;  %v2109_v17 = vpop.permute.xlu1 %2108 }
 0x82d   :  { %2112 = vrot.lane.b32.xlu0 %v2089_v13, %s4053_s14  ;;  %v2117_v24 = vpop.permute.xlu1 %2116 }
 0x898   :  { %v3216_v40 = vpop.xlane.xlu0 %3215 }
 0x899   :  { %v3220_v42 = vmul.f32 0.03125, %v3216_v40 }
 0x89b   :  { %v3222_v53 = vadd.f32 1e-05, %v3220_v42 }
 0x89c   :  { %v3219_v50 = vpop.xlane.xlu0 %3218 }
 0x89d   :  { %3805 = vrsqrt.f32 %v3222_v53  ;;  %v3221_v58 = vmul.f32 0.03125, %v3219_v50 }
 0x89f   :  { %v3223_v54 = vadd.f32 1e-05, %v3221_v58 }
 0x8a0   :  { %v2097_v1 = vpop.permute.xlu0 %2096 }
 0x8a1   :  { %3807 = vrsqrt.f32 %v3223_v54  ;;  %v2120_v13 = vsel %vm144_vm0, %v2119_v0, %v2097_v1 }
 0x8a2   :  { %v2122_v18 = vsel %vm2121_vm5, %v2120_v13, %v2101_v57 }
 0x8a3   :  { %v2124_v59 = vsel %vm2123_vm4, %v2122_v18, %v2105_v46 }
 0x8a4   :  { %v2126_v48 = vsel %vm2125_vm6, %v2124_v59, %v2109_v17  ;;  %v2113_v51 = vpop.permute.xlu0 %2112 }
 0x8a5   :  { %v2128_v43 = vsel %vm2127_vm7, %v2126_v48, %v2113_v51 }
 0x8a6   :  { %v2130_v44 = vsel %vm2129_vm8, %v2128_v43, %v2117_v24 }
 0x8a7   :  { %2132 = vst.msk [vmem:[#allocation17] sm:$0xff] %vm2131_vm9, %v2130_v44 }
 0x8aa   :  { %v3806_v47 = vpop.eup %3805 }
 0x8ab   :  { %v3226_v56 = vmul.f32 %v3806_v47, %v3210_v37 }
 0x8ad   :  { %3720 = vmatprep.mubr.msk.f32.mxu0 %vm2123_vm4, %v3226_v56 }
 0x8ae   :  { %v3808_v3 = vpop.eup %3807 }
 0x8af   :  { %v3227_v60 = vmul.f32 %v3808_v3, %v3211_v5 }
 0x8b1   :  { %3721 = vmatmul.mubr.msk.f32.vlgmr.msra.gmra.mxu0 %vm2123_vm4, %v3227_v60 }
 0x971   :  { %v3722_v12 = vpop.f32.mrf.mxu0 }
 0x972   :  { %v3314_v15 = vadd.f32 %v3722_v12, %v3235_v11 }
 0x973   :  { %v3308_v14 = vpop.f32.mrf.mxu0 }
 0x974   :  { %v3529_v63 = vmul.f32 -1.442695, %v3314_v15  ;;  %v3309_v16 = vadd.f32 %v3308_v14, %v3235_v11 }
 0x976   :  { %3809 = vpow2.f32 %v3529_v63  ;;  %v3528_v30 = vmul.f32 -1.442695, %v3309_v16 }
 0x978   :  { %3811 = vpow2.f32 %v3528_v30 }
 0x983   :  { %v3810_v19 = vpop.eup %3809 }
 0x984   :  { %v3324_v20 = vadd.f32 1.0, %v3810_v19 }
 0x985   :  { %v3812_v21 = vpop.eup %3811 }
 0x986   :  { %v3323_v22 = vadd.f32 1.0, %v3812_v21  ;;  %3813 = vrcp.f32 %v3324_v20 }
 0x988   :  { %3815 = vrcp.f32 %v3323_v22 }
 0x993   :  { %v3814_v26 = vpop.eup %3813 }
 0x994   :  { %v3330_v4 = vmul.f32 %v3814_v26, %v3314_v15 }
 0x995   :  { %v3816_v27 = vpop.eup %3815 }
 0x996   :  { %v3329_v28 = vmul.f32 %v3816_v27, %v3309_v16 }
 0x998   :  { %3731 = vmatprep.mubr.msk.f32.mxu1 %vm2123_vm4, %v3329_v28 }
 0x999   :  { %3732 = vmatmul.mubr.msk.f32.vlgmr.msra.gmra.mxu1 %vm2123_vm4, %v3330_v4 }
 0x99a   :  { %3969 = shalt.err (!%p3966_p11)
}
 0x99b   :  { %3452 = dma.vmem_to_hbm [thread:$0]  %s3447_s17, 256, %s4737_s11, [#allocation16], %s4032_s26, %s4032_s26, %s4033_s27  }
 0x99c   :  { %s4055_s3 = smov [#allocation17]  }
 0x99d   :  { %s3459_s19 = sshll.u32 %s4055_s3, 4  ;;  %s3460_s19 = int_to_ptr.vmem [resolvable:$true] %s3459_s19 }
 0x99e   :  { %s3978_s20 = scalar_lea.vmem %s3460_s19, 128  ;;  %p3983_p13 = scmp.lt.s32.totalorder %s3460_s19, %s3460_s19 }
 0x99f   :  { %p3979_p12 = scmp.ne.s32.totalorder %s3460_s19, %s3978_s20  ;;  %p3984_p0 = scmp.lt.s32.totalorder %s3978_s20, %s3978_s20 }
 0x9a1   :  { %p3985_p1 = por %p3984_p0, %p3983_p13 }
 0x9a3   :  { %p3986_p2 = pnand %p3985_p1, %p3979_p12 }
 0x9a5   :  { %3989 = shalt.err (!%p3986_p2)
}
 0x9a6   :  { %3462 = dma.vmem_to_hbm [thread:$0]  %s3460_s19, 128, %s4738_s12, [#allocation16]   ;;  %v3337_v29 = vsub.s32 3, %v4179_v31 }
 0x9a7   :  { %s3735_s5 = spop %3734  ;;  %s4056_s11 = smov [#allocation14]  }
 0x9a8   :  { %v3338_v34 = vrot.slane %v3817_v62, %v3337_v29  ;;  %v3420_v5 = vstv %s3735_s5  ;;  %s3434_s21 = sshll.u32 %s4056_s11, 4  ;;  %s3435_s21 = int_to_ptr.vmem [resolvable:$true] %s3434_s21 }
 0x9a9   :  { %s3998_s12 = scalar_lea.vmem %s3435_s21, 256  ;;  %p4003_p4 = scmp.lt.s32.totalorder %s3435_s21, %s3435_s21 }
 0x9aa   :  { %p3999_p3 = scmp.ne.s32.totalorder %s3435_s21, %s3998_s12  ;;  %p4004_p5 = scmp.lt.s32.totalorder %s3998_s12, %s3998_s12 }
 0x9ac   :  { %p4005_p6 = por %p4004_p5, %p4003_p4 }
 0x9ae   :  { %p4006_p7 = pnand %p4005_p6, %p3999_p3 }
 0xa59   :  { %v3733_v35 = vpop.f32.mrf.mxu1 }
 0xa5a   :  { %v3417_v37 = vadd.f32 %v3733_v35, %v3338_v34 }
 0xa5b   :  { %v3411_v38 = vpop.f32.mrf.mxu1 }
 0xa5c   :  { %v3422_v6 = vmul.f32 %v3420_v5, %v3417_v37  ;;  %v3412_v33 = vadd.f32 %v3411_v38, %v3338_v34 }
 0xa5e   :  { %v3424_v55 = vadd.f32 %v3422_v6, %v4652_v25  ;;  %v3421_v49 = vmul.f32 %v3420_v5, %v3412_v33 }
 0xa60   :  { %v3426_v7 = vmul.f32 %v3424_v55, %v4647_v32  ;;  %v3423_v8 = vadd.f32 %v3421_v49, %v4655_v23 }
 0xa62   :  { %3428 = vst.msk [vmem:[#allocation14 + $0x8] sm:$0xff] %vm2123_vm4, %v3426_v7  ;;  %v3425_v31 = vmul.f32 %v3423_v8, %v4649_v36 }
 0xa64   :  { %3427 = vst.msk [vmem:[#allocation14] sm:$0xff] %vm2123_vm4, %v3425_v31 }
 0xa65   :  { %4009 = shalt.err (!%p4006_p7)
}
 0xa66   :  { %3440 = dma.vmem_to_hbm [thread:$0]  %s3435_s21, 256, %s4736_s10, [#allocation4], %s4032_s26, %s4032_s26, %s4033_s27  }
 0xa67   :  { %4026 = dma.done.wait [#allocation4], 256  }
 0xa68   :  { %4027 = vsyncadd [#allocation4], 4294967040 }
 0xa69   :  { %4028 = dma.done.wait [#allocation16], 384  }
 0xa6a   :  { %4029 = vsyncadd [#allocation16], 4294966912 }
 0xa6b   :  { %3472 = vsyncpa [#allocation3], 1 }
 0xa6c   :  { %3473 = vsyncpa [#allocation6], 1 }
 0xa6d   :  { %3474 = vsyncpa [#allocation9], 1 }
 0xa6e   :  { %3475 = vsyncpa [#allocation12], 1 }
 0xa6f   :  { %3476 = vsyncpa [#allocation4], 1 }
 0xa70   :  { %3477 = vsyncpa [#allocation16], 1 }

</bundles_post_ra>
